<compile_context>
chip_gen: v7x
topology: tpu7x:2x2x1
jax: 0.10.0
libtpu: 0.0.40
codegen_flags: <defaults>
</compile_context>

<pallas_src>
import jax
import jax.numpy as jnp
from jax.experimental import pallas as pl
from jax.experimental.pallas import tpu as pltpu

FEATURE_DIM = 128          # stand-in for coat_small.num_features
HIDDEN = 512
N_CLASSES = 7
OUT_PAD = 128              # lane-dense padded logits width (sliced to 7 outside)
MIN_TILE = 16              # bf16 sublane packing for the output block


# ---------------------------------------------------------------------------
# Fused kernel: per-batch-tile backbone (x4 views) + classifier head.
# ---------------------------------------------------------------------------
def _odir_fused_kernel(x1_ref, x2_ref, x3_ref, xv_ref,
                       wf_ref, bf_ref, w1_ref, b1_ref, w2_ref, b2_ref,
                       o_ref):
    # x*_ref : (TB, C*S) f32        wf_ref : (C, F) f32 (tiny)
    # w1_ref : (4F, 512) bf16       w2_ref : (512, 128) bf16 (lane-padded)
    C, _ = wf_ref.shape
    S = x1_ref.shape[1] // C
    inv_s = 1.0 / S
    wf = wf_ref[...]
    bf = bf_ref[...]

    def backbone(x_ref):
        # coat_small stand-in: global average pool over spatial (per-channel
        # lane-slice reduce, S-aligned static slices) + linear C -> F.
        # C is tiny, so broadcast-multiplies on the VPU beat an MXU K=C dot.
        f = bf                                                   # (1, F)
        for c in range(C):
            m_c = jnp.sum(x_ref[:, c * S:(c + 1) * S], axis=-1,
                          keepdims=True) * inv_s                 # (TB, 1)
            f = f + m_c * wf[c:c + 1, :]                         # -> (TB, F)
        return f

    # torch.cat([f1, f2, f3, f_vessel], dim=1): lane-aligned concat of four
    # F-wide blocks feeding a single K=4F head matmul.
    feats = jnp.concatenate(
        [backbone(x1_ref), backbone(x2_ref), backbone(x3_ref), backbone(xv_ref)],
        axis=-1).astype(jnp.bfloat16)                            # (TB, 4F)

    # Linear(4F, 512) -> ReLU -> Dropout(0.5)==identity (eval) -> Linear(512, 7)
    h = jnp.dot(feats, w1_ref[...],
                preferred_element_type=jnp.float32) + b1_ref[...]
    h = jnp.maximum(h, 0.0).astype(jnp.bfloat16)
    o_ref[...] = (jnp.dot(h, w2_ref[...], preferred_element_type=jnp.float32)
                  + b2_ref[...]).astype(o_ref.dtype)


# ---------------------------------------------------------------------------
# Tiling / wrapper
# ---------------------------------------------------------------------------
def _pick_tiling(batch, cs):
    """Pick (batch_tile, scoped_vmem_limit) per TPU generation."""
    try:
        vmem_cap = int(pltpu.get_tpu_info().vmem_capacity_bytes)
    except Exception:
        vmem_cap = 64 << 20                    # conservative (v7x per-TC VMEM)
    scoped = min((vmem_cap * 3) // 4, 100 << 20)

    # x tiles: 4 views, f32, double-buffered by the BlockSpec pipeline.
    x_budget = max(scoped - (8 << 20), 8 << 20)
    row_bytes = 4 * cs * 4 * 2
    tb = max(x_budget // row_bytes, MIN_TILE)
    if tb >= 256:
        tb = (tb // 256) * 256                 # MXU M alignment (v6e/v7x)
    else:
        tb = (tb // MIN_TILE) * MIN_TILE       # bf16 sublane packing

    batch_padded = ((batch + MIN_TILE - 1) // MIN_TILE) * MIN_TILE
    tb = min(tb, batch_padded)
    # Keep >=2 grid steps when the batch allows so dimension_semantics
    # ("parallel",) actually shards the grid across v7x's two TensorCores.
    if batch_padded >= 2 * MIN_TILE and batch_padded // tb < 2:
        half = -(-batch_padded // 2)
        tb = ((half + MIN_TILE - 1) // MIN_TILE) * MIN_TILE
    return tb, scoped


def prepare_params(params):
    """One-time weight packing (hoisted out of the per-call forward path)."""
    return {
        "wf": params["wf"].astype(jnp.float32),            # (C, F)   tiny
        "bf": params["bf"].astype(jnp.float32),             # (1, F)
        "w1": params["w1"].astype(jnp.bfloat16),             # (4F, 512)
        "b1": params["b1"].astype(jnp.float32),              # (1, 512)
        "w2": jnp.pad(params["w2"],
                      ((0, 0), (0, OUT_PAD - N_CLASSES))).astype(jnp.bfloat16),
        "b2": jnp.pad(params["b2"],
                      ((0, 0), (0, OUT_PAD - N_CLASSES))).astype(jnp.float32),
    }


def odir_forward(prepped, x1, x2, x3, vessel):
    """Mirrors ODIRClassifier.forward(x1, x2, x3, vessel) -> (B, 7) logits."""
    B, C, H, W = x1.shape
    S = H * W
    CS = C * S
    F = prepped["wf"].shape[1]
    assert prepped["w1"].shape == (4 * F, HIDDEN)

    # Flatten NCHW -> (B, C*S); stream f32 directly (no separate cast pass).
    xs = [x.reshape(B, CS) for x in (x1, x2, x3, vessel)]

    TB, scoped_vmem = _pick_tiling(B, CS)
    Bp = pl.cdiv(max(B, TB), TB) * TB
    if Bp != B:
        xs = [jnp.pad(x, ((0, Bp - B), (0, 0))) for x in xs]

    x_spec = pl.BlockSpec((TB, CS), lambda i: (i, 0))

    def resident(shape):
        # Constant index_map -> fetched once and kept in VMEM across the grid.
        # Total resident weight bytes < 1 MiB after bf16 packing, so the
        # default double-buffering of these blocks is negligible.
        return pl.BlockSpec(shape, lambda i: (0, 0))

    out = pl.pallas_call(
        _odir_fused_kernel,
        out_shape=jax.ShapeDtypeStruct((Bp, OUT_PAD), jnp.bfloat16),
        grid=(Bp // TB,),
        in_specs=[x_spec, x_spec, x_spec, x_spec,
                  resident((C, F)), resident((1, F)),
                  resident((4 * F, HIDDEN)), resident((1, HIDDEN)),
                  resident((HIDDEN, OUT_PAD)), resident((1, OUT_PAD))],
        out_specs=pl.BlockSpec((TB, OUT_PAD), lambda i: (i, 0)),
        compiler_params=pltpu.CompilerParams(
            dimension_semantics=("parallel",),      # megacore shard on v7x
            vmem_limit_bytes=int(scoped_vmem),
        ),
    )(xs[0], xs[1], xs[2], xs[3],
      prepped["wf"], prepped["bf"], prepped["w1"], prepped["b1"],
      prepped["w2"], prepped["b2"])

    return out[:B, :N_CLASSES].astype(jnp.float32)


def init_params(key, in_channels):
    k = jax.random.split(key, 3)
    return {
        "wf": 0.02 * jax.random.normal(k[0], (in_channels, FEATURE_DIM), jnp.float32),
        "bf": jnp.zeros((1, FEATURE_DIM), jnp.float32),
        "w1": 0.02 * jax.random.normal(k[1], (4 * FEATURE_DIM, HIDDEN), jnp.float32),
        "b1": jnp.zeros((1, HIDDEN), jnp.float32),
        "w2": 0.02 * jax.random.normal(k[2], (HIDDEN, N_CLASSES), jnp.float32),
        "b2": jnp.zeros((1, N_CLASSES), jnp.float32),
    }


# ---------------------------------------------------------------------------
# Demo
# ---------------------------------------------------------------------------
if __name__ == "__main__":
    key = jax.random.PRNGKey(0)
    kp, k1, k2, k3, k4 = jax.random.split(key, 5)

    B, C, H, W = 2, 3, 16, 16                       # small NCHW images
    x1 = jax.random.normal(k1, (B, C, H, W), jnp.float32)
    x2 = jax.random.normal(k2, (B, C, H, W), jnp.float32)
    x3 = jax.random.normal(k3, (B, C, H, W), jnp.float32)
    vessel = jax.random.normal(k4, (B, C, H, W), jnp.float32)

    prepped = prepare_params(init_params(kp, C))    # one-time weight packing

    out = odir_forward(prepped, x1, x2, x3, vessel)
    out = jax.block_until_ready(out)
    assert out.shape == (B, N_CLASSES), out.shape
    print("KERNEL_OK")
</pallas_src>

<mosaic_0001>
module attributes {stable_mosaic.version = 11 : i64} {
  func.func @_odir_fused_kernel(%arg0: i32, %arg1: memref<16x768xf32, #tpu.memory_space<vmem>>, %arg2: memref<16x768xf32, #tpu.memory_space<vmem>>, %arg3: memref<16x768xf32, #tpu.memory_space<vmem>>, %arg4: memref<16x768xf32, #tpu.memory_space<vmem>>, %arg5: memref<3x128xf32, #tpu.memory_space<vmem>>, %arg6: memref<1x128xf32, #tpu.memory_space<vmem>>, %arg7: memref<512x512xbf16, #tpu.memory_space<vmem>>, %arg8: memref<1x512xf32, #tpu.memory_space<vmem>>, %arg9: memref<512x128xbf16, #tpu.memory_space<vmem>>, %arg10: memref<1x128xf32, #tpu.memory_space<vmem>>, %arg11: memref<16x128xbf16, #tpu.memory_space<vmem>>) attributes {dimension_semantics = [#tpu.dimension_semantics<parallel>], iteration_bounds = array<i64: 1>, scalar_prefetch = 0 : i64, scratch_operands = 0 : i64, tpu.core_type = #tpu.core_type<tc>, window_params = [{transform_indices = @transform_0, window_bounds = array<i64: 16, 768>}, {transform_indices = @transform_1, window_bounds = array<i64: 16, 768>}, {transform_indices = @transform_2, window_bounds = array<i64: 16, 768>}, {transform_indices = @transform_3, window_bounds = array<i64: 16, 768>}, {pipeline_mode = #tpu.pipeline_mode<synchronous>, transform_indices = @transform_4, window_bounds = array<i64: 3, 128>}, {pipeline_mode = #tpu.pipeline_mode<synchronous>, transform_indices = @transform_5, window_bounds = array<i64: 1, 128>}, {pipeline_mode = #tpu.pipeline_mode<synchronous>, transform_indices = @transform_6, window_bounds = array<i64: 512, 512>}, {pipeline_mode = #tpu.pipeline_mode<synchronous>, transform_indices = @transform_7, window_bounds = array<i64: 1, 512>}, {pipeline_mode = #tpu.pipeline_mode<synchronous>, transform_indices = @transform_8, window_bounds = array<i64: 512, 128>}, {pipeline_mode = #tpu.pipeline_mode<synchronous>, transform_indices = @transform_9, window_bounds = array<i64: 1, 128>}, {transform_indices = @transform_10, window_bounds = array<i64: 16, 128>}]} {
    %c0 = arith.constant 0 : index
    %c0_0 = arith.constant 0 : index
    %0 = vector.load %arg5[%c0, %c0_0] : memref<3x128xf32, #tpu.memory_space<vmem>>, vector<3x128xf32>
    %c0_1 = arith.constant 0 : index
    %c0_2 = arith.constant 0 : index
    %1 = vector.load %arg6[%c0_1, %c0_2] : memref<1x128xf32, #tpu.memory_space<vmem>>, vector<1x128xf32>
    %c0_3 = arith.constant 0 : index
    %c0_4 = arith.constant 0 : index
    %2 = vector.load %arg1[%c0_3, %c0_4] : memref<16x768xf32, #tpu.memory_space<vmem>>, vector<16x256xf32>
    %cst = arith.constant dense<0.000000e+00> : vector<16xf32>
    %3 = vector.multi_reduction <add>, %2, %cst [1] : vector<16x256xf32> to vector<16xf32>
    %4 = vector.shape_cast %3 : vector<16xf32> to vector<16x1xf32>
    %cst_5 = arith.constant 3.906250e-03 : f32
    %5 = vector.broadcast %cst_5 : f32 to vector<16x1xf32>
    %6 = arith.mulf %4, %5 : vector<16x1xf32>
    %7 = vector.extract_strided_slice %0 {offsets = [0, 0], sizes = [1, 128], strides = [1, 1]} : vector<3x128xf32> to vector<1x128xf32>
    %8 = vector.broadcast %6 : vector<16x1xf32> to vector<16x128xf32>
    %9 = vector.broadcast %7 : vector<1x128xf32> to vector<16x128xf32>
    %10 = arith.mulf %8, %9 : vector<16x128xf32>
    %11 = vector.broadcast %1 : vector<1x128xf32> to vector<16x128xf32>
    %12 = arith.addf %11, %10 : vector<16x128xf32>
    %c0_6 = arith.constant 0 : index
    %c256 = arith.constant 256 : index
    %13 = vector.load %arg1[%c0_6, %c256] : memref<16x768xf32, #tpu.memory_space<vmem>>, vector<16x256xf32>
    %cst_7 = arith.constant dense<0.000000e+00> : vector<16xf32>
    %14 = vector.multi_reduction <add>, %13, %cst_7 [1] : vector<16x256xf32> to vector<16xf32>
    %15 = vector.shape_cast %14 : vector<16xf32> to vector<16x1xf32>
    %cst_8 = arith.constant 3.906250e-03 : f32
    %16 = vector.broadcast %cst_8 : f32 to vector<16x1xf32>
    %17 = arith.mulf %15, %16 : vector<16x1xf32>
    %18 = vector.extract_strided_slice %0 {offsets = [1, 0], sizes = [1, 128], strides = [1, 1]} : vector<3x128xf32> to vector<1x128xf32>
    %19 = vector.broadcast %17 : vector<16x1xf32> to vector<16x128xf32>
    %20 = vector.broadcast %18 : vector<1x128xf32> to vector<16x128xf32>
    %21 = arith.mulf %19, %20 : vector<16x128xf32>
    %22 = arith.addf %12, %21 : vector<16x128xf32>
    %c0_9 = arith.constant 0 : index
    %c512 = arith.constant 512 : index
    %23 = vector.load %arg1[%c0_9, %c512] : memref<16x768xf32, #tpu.memory_space<vmem>>, vector<16x256xf32>
    %cst_10 = arith.constant dense<0.000000e+00> : vector<16xf32>
    %24 = vector.multi_reduction <add>, %23, %cst_10 [1] : vector<16x256xf32> to vector<16xf32>
    %25 = vector.shape_cast %24 : vector<16xf32> to vector<16x1xf32>
    %cst_11 = arith.constant 3.906250e-03 : f32
    %26 = vector.broadcast %cst_11 : f32 to vector<16x1xf32>
    %27 = arith.mulf %25, %26 : vector<16x1xf32>
    %28 = vector.extract_strided_slice %0 {offsets = [2, 0], sizes = [1, 128], strides = [1, 1]} : vector<3x128xf32> to vector<1x128xf32>
    %29 = vector.broadcast %27 : vector<16x1xf32> to vector<16x128xf32>
    %30 = vector.broadcast %28 : vector<1x128xf32> to vector<16x128xf32>
    %31 = arith.mulf %29, %30 : vector<16x128xf32>
    %32 = arith.addf %22, %31 : vector<16x128xf32>
    %c0_12 = arith.constant 0 : index
    %c0_13 = arith.constant 0 : index
    %33 = vector.load %arg2[%c0_12, %c0_13] : memref<16x768xf32, #tpu.memory_space<vmem>>, vector<16x256xf32>
    %cst_14 = arith.constant dense<0.000000e+00> : vector<16xf32>
    %34 = vector.multi_reduction <add>, %33, %cst_14 [1] : vector<16x256xf32> to vector<16xf32>
    %35 = vector.shape_cast %34 : vector<16xf32> to vector<16x1xf32>
    %cst_15 = arith.constant 3.906250e-03 : f32
    %36 = vector.broadcast %cst_15 : f32 to vector<16x1xf32>
    %37 = arith.mulf %35, %36 : vector<16x1xf32>
    %38 = vector.extract_strided_slice %0 {offsets = [0, 0], sizes = [1, 128], strides = [1, 1]} : vector<3x128xf32> to vector<1x128xf32>
    %39 = vector.broadcast %37 : vector<16x1xf32> to vector<16x128xf32>
    %40 = vector.broadcast %38 : vector<1x128xf32> to vector<16x128xf32>
    %41 = arith.mulf %39, %40 : vector<16x128xf32>
    %42 = vector.broadcast %1 : vector<1x128xf32> to vector<16x128xf32>
    %43 = arith.addf %42, %41 : vector<16x128xf32>
    %c0_16 = arith.constant 0 : index
    %c256_17 = arith.constant 256 : index
    %44 = vector.load %arg2[%c0_16, %c256_17] : memref<16x768xf32, #tpu.memory_space<vmem>>, vector<16x256xf32>
    %cst_18 = arith.constant dense<0.000000e+00> : vector<16xf32>
    %45 = vector.multi_reduction <add>, %44, %cst_18 [1] : vector<16x256xf32> to vector<16xf32>
    %46 = vector.shape_cast %45 : vector<16xf32> to vector<16x1xf32>
    %cst_19 = arith.constant 3.906250e-03 : f32
    %47 = vector.broadcast %cst_19 : f32 to vector<16x1xf32>
    %48 = arith.mulf %46, %47 : vector<16x1xf32>
    %49 = vector.extract_strided_slice %0 {offsets = [1, 0], sizes = [1, 128], strides = [1, 1]} : vector<3x128xf32> to vector<1x128xf32>
    %50 = vector.broadcast %48 : vector<16x1xf32> to vector<16x128xf32>
    %51 = vector.broadcast %49 : vector<1x128xf32> to vector<16x128xf32>
    %52 = arith.mulf %50, %51 : vector<16x128xf32>
    %53 = arith.addf %43, %52 : vector<16x128xf32>
    %c0_20 = arith.constant 0 : index
    %c512_21 = arith.constant 512 : index
    %54 = vector.load %arg2[%c0_20, %c512_21] : memref<16x768xf32, #tpu.memory_space<vmem>>, vector<16x256xf32>
    %cst_22 = arith.constant dense<0.000000e+00> : vector<16xf32>
    %55 = vector.multi_reduction <add>, %54, %cst_22 [1] : vector<16x256xf32> to vector<16xf32>
    %56 = vector.shape_cast %55 : vector<16xf32> to vector<16x1xf32>
    %cst_23 = arith.constant 3.906250e-03 : f32
    %57 = vector.broadcast %cst_23 : f32 to vector<16x1xf32>
    %58 = arith.mulf %56, %57 : vector<16x1xf32>
    %59 = vector.extract_strided_slice %0 {offsets = [2, 0], sizes = [1, 128], strides = [1, 1]} : vector<3x128xf32> to vector<1x128xf32>
    %60 = vector.broadcast %58 : vector<16x1xf32> to vector<16x128xf32>
    %61 = vector.broadcast %59 : vector<1x128xf32> to vector<16x128xf32>
    %62 = arith.mulf %60, %61 : vector<16x128xf32>
    %63 = arith.addf %53, %62 : vector<16x128xf32>
    %c0_24 = arith.constant 0 : index
    %c0_25 = arith.constant 0 : index
    %64 = vector.load %arg3[%c0_24, %c0_25] : memref<16x768xf32, #tpu.memory_space<vmem>>, vector<16x256xf32>
    %cst_26 = arith.constant dense<0.000000e+00> : vector<16xf32>
    %65 = vector.multi_reduction <add>, %64, %cst_26 [1] : vector<16x256xf32> to vector<16xf32>
    %66 = vector.shape_cast %65 : vector<16xf32> to vector<16x1xf32>
    %cst_27 = arith.constant 3.906250e-03 : f32
    %67 = vector.broadcast %cst_27 : f32 to vector<16x1xf32>
    %68 = arith.mulf %66, %67 : vector<16x1xf32>
    %69 = vector.extract_strided_slice %0 {offsets = [0, 0], sizes = [1, 128], strides = [1, 1]} : vector<3x128xf32> to vector<1x128xf32>
    %70 = vector.broadcast %68 : vector<16x1xf32> to vector<16x128xf32>
    %71 = vector.broadcast %69 : vector<1x128xf32> to vector<16x128xf32>
    %72 = arith.mulf %70, %71 : vector<16x128xf32>
    %73 = vector.broadcast %1 : vector<1x128xf32> to vector<16x128xf32>
    %74 = arith.addf %73, %72 : vector<16x128xf32>
    %c0_28 = arith.constant 0 : index
    %c256_29 = arith.constant 256 : index
    %75 = vector.load %arg3[%c0_28, %c256_29] : memref<16x768xf32, #tpu.memory_space<vmem>>, vector<16x256xf32>
    %cst_30 = arith.constant dense<0.000000e+00> : vector<16xf32>
    %76 = vector.multi_reduction <add>, %75, %cst_30 [1] : vector<16x256xf32> to vector<16xf32>
    %77 = vector.shape_cast %76 : vector<16xf32> to vector<16x1xf32>
    %cst_31 = arith.constant 3.906250e-03 : f32
    %78 = vector.broadcast %cst_31 : f32 to vector<16x1xf32>
    %79 = arith.mulf %77, %78 : vector<16x1xf32>
    %80 = vector.extract_strided_slice %0 {offsets = [1, 0], sizes = [1, 128], strides = [1, 1]} : vector<3x128xf32> to vector<1x128xf32>
    %81 = vector.broadcast %79 : vector<16x1xf32> to vector<16x128xf32>
    %82 = vector.broadcast %80 : vector<1x128xf32> to vector<16x128xf32>
    %83 = arith.mulf %81, %82 : vector<16x128xf32>
    %84 = arith.addf %74, %83 : vector<16x128xf32>
    %c0_32 = arith.constant 0 : index
    %c512_33 = arith.constant 512 : index
    %85 = vector.load %arg3[%c0_32, %c512_33] : memref<16x768xf32, #tpu.memory_space<vmem>>, vector<16x256xf32>
    %cst_34 = arith.constant dense<0.000000e+00> : vector<16xf32>
    %86 = vector.multi_reduction <add>, %85, %cst_34 [1] : vector<16x256xf32> to vector<16xf32>
    %87 = vector.shape_cast %86 : vector<16xf32> to vector<16x1xf32>
    %cst_35 = arith.constant 3.906250e-03 : f32
    %88 = vector.broadcast %cst_35 : f32 to vector<16x1xf32>
    %89 = arith.mulf %87, %88 : vector<16x1xf32>
    %90 = vector.extract_strided_slice %0 {offsets = [2, 0], sizes = [1, 128], strides = [1, 1]} : vector<3x128xf32> to vector<1x128xf32>
    %91 = vector.broadcast %89 : vector<16x1xf32> to vector<16x128xf32>
    %92 = vector.broadcast %90 : vector<1x128xf32> to vector<16x128xf32>
    %93 = arith.mulf %91, %92 : vector<16x128xf32>
    %94 = arith.addf %84, %93 : vector<16x128xf32>
    %c0_36 = arith.constant 0 : index
    %c0_37 = arith.constant 0 : index
    %95 = vector.load %arg4[%c0_36, %c0_37] : memref<16x768xf32, #tpu.memory_space<vmem>>, vector<16x256xf32>
    %cst_38 = arith.constant dense<0.000000e+00> : vector<16xf32>
    %96 = vector.multi_reduction <add>, %95, %cst_38 [1] : vector<16x256xf32> to vector<16xf32>
    %97 = vector.shape_cast %96 : vector<16xf32> to vector<16x1xf32>
    %cst_39 = arith.constant 3.906250e-03 : f32
    %98 = vector.broadcast %cst_39 : f32 to vector<16x1xf32>
    %99 = arith.mulf %97, %98 : vector<16x1xf32>
    %100 = vector.extract_strided_slice %0 {offsets = [0, 0], sizes = [1, 128], strides = [1, 1]} : vector<3x128xf32> to vector<1x128xf32>
    %101 = vector.broadcast %99 : vector<16x1xf32> to vector<16x128xf32>
    %102 = vector.broadcast %100 : vector<1x128xf32> to vector<16x128xf32>
    %103 = arith.mulf %101, %102 : vector<16x128xf32>
    %104 = vector.broadcast %1 : vector<1x128xf32> to vector<16x128xf32>
    %105 = arith.addf %104, %103 : vector<16x128xf32>
    %c0_40 = arith.constant 0 : index
    %c256_41 = arith.constant 256 : index
    %106 = vector.load %arg4[%c0_40, %c256_41] : memref<16x768xf32, #tpu.memory_space<vmem>>, vector<16x256xf32>
    %cst_42 = arith.constant dense<0.000000e+00> : vector<16xf32>
    %107 = vector.multi_reduction <add>, %106, %cst_42 [1] : vector<16x256xf32> to vector<16xf32>
    %108 = vector.shape_cast %107 : vector<16xf32> to vector<16x1xf32>
    %cst_43 = arith.constant 3.906250e-03 : f32
    %109 = vector.broadcast %cst_43 : f32 to vector<16x1xf32>
    %110 = arith.mulf %108, %109 : vector<16x1xf32>
    %111 = vector.extract_strided_slice %0 {offsets = [1, 0], sizes = [1, 128], strides = [1, 1]} : vector<3x128xf32> to vector<1x128xf32>
    %112 = vector.broadcast %110 : vector<16x1xf32> to vector<16x128xf32>
    %113 = vector.broadcast %111 : vector<1x128xf32> to vector<16x128xf32>
    %114 = arith.mulf %112, %113 : vector<16x128xf32>
    %115 = arith.addf %105, %114 : vector<16x128xf32>
    %c0_44 = arith.constant 0 : index
    %c512_45 = arith.constant 512 : index
    %116 = vector.load %arg4[%c0_44, %c512_45] : memref<16x768xf32, #tpu.memory_space<vmem>>, vector<16x256xf32>
    %cst_46 = arith.constant dense<0.000000e+00> : vector<16xf32>
    %117 = vector.multi_reduction <add>, %116, %cst_46 [1] : vector<16x256xf32> to vector<16xf32>
    %118 = vector.shape_cast %117 : vector<16xf32> to vector<16x1xf32>
    %cst_47 = arith.constant 3.906250e-03 : f32
    %119 = vector.broadcast %cst_47 : f32 to vector<16x1xf32>
    %120 = arith.mulf %118, %119 : vector<16x1xf32>
    %121 = vector.extract_strided_slice %0 {offsets = [2, 0], sizes = [1, 128], strides = [1, 1]} : vector<3x128xf32> to vector<1x128xf32>
    %122 = vector.broadcast %120 : vector<16x1xf32> to vector<16x128xf32>
    %123 = vector.broadcast %121 : vector<1x128xf32> to vector<16x128xf32>
    %124 = arith.mulf %122, %123 : vector<16x128xf32>
    %125 = arith.addf %115, %124 : vector<16x128xf32>
    %126 = tpu.concatenate %32, %63, %94, %125 in 1 : vector<16x128xf32>, vector<16x128xf32>, vector<16x128xf32>, vector<16x128xf32> -> vector<16x512xf32>
    %127 = arith.truncf %126 : vector<16x512xf32> to vector<16x512xbf16>
    %c0_48 = arith.constant 0 : index
    %c0_49 = arith.constant 0 : index
    %128 = vector.load %arg7[%c0_48, %c0_49] : memref<512x512xbf16, #tpu.memory_space<vmem>>, vector<512x512xbf16>
    %cst_50 = arith.constant dense<0.000000e+00> : vector<16x512xf32>
    %129 = tpu.matmul %127, %128, %cst_50 {dimension_numbers = #tpu.dot_dimension_numbers<[1], [0], [0], [1], [0, 0, 1, 1], [], []>} : vector<16x512xbf16>, vector<512x512xbf16>, vector<16x512xf32> -> vector<16x512xf32>
    %c0_51 = arith.constant 0 : index
    %c0_52 = arith.constant 0 : index
    %130 = vector.load %arg8[%c0_51, %c0_52] : memref<1x512xf32, #tpu.memory_space<vmem>>, vector<1x512xf32>
    %131 = vector.broadcast %130 : vector<1x512xf32> to vector<16x512xf32>
    %132 = arith.addf %129, %131 : vector<16x512xf32>
    %cst_53 = arith.constant 0.000000e+00 : f32
    %133 = vector.broadcast %cst_53 : f32 to vector<16x512xf32>
    %134 = arith.maximumf %132, %133 : vector<16x512xf32>
    %135 = arith.truncf %134 : vector<16x512xf32> to vector<16x512xbf16>
    %c0_54 = arith.constant 0 : index
    %c0_55 = arith.constant 0 : index
    %136 = vector.load %arg9[%c0_54, %c0_55] : memref<512x128xbf16, #tpu.memory_space<vmem>>, vector<512x128xbf16>
    %cst_56 = arith.constant dense<0.000000e+00> : vector<16x128xf32>
    %137 = tpu.matmul %135, %136, %cst_56 {dimension_numbers = #tpu.dot_dimension_numbers<[1], [0], [0], [1], [0, 0, 1, 1], [], []>} : vector<16x512xbf16>, vector<512x128xbf16>, vector<16x128xf32> -> vector<16x128xf32>
    %c0_57 = arith.constant 0 : index
    %c0_58 = arith.constant 0 : index
    %138 = vector.load %arg10[%c0_57, %c0_58] : memref<1x128xf32, #tpu.memory_space<vmem>>, vector<1x128xf32>
    %139 = vector.broadcast %138 : vector<1x128xf32> to vector<16x128xf32>
    %140 = arith.addf %137, %139 : vector<16x128xf32>
    %141 = arith.truncf %140 : vector<16x128xf32> to vector<16x128xbf16>
    %c0_59 = arith.constant 0 : index
    %c0_60 = arith.constant 0 : index
    %142 = vector.load %arg11[%c0_59, %c0_60] : memref<16x128xbf16, #tpu.memory_space<vmem>>, vector<16x128xbf16>
    tpu.vector_store %arg11[%c0_59, %c0_60], %141 {strides = array<i32>} : memref<16x128xbf16, #tpu.memory_space<vmem>>, vector<16x128xbf16>,
    return
  }
  func.func @transform_0(%arg0: i32) -> (i32, i32) {
    %c0_i32 = arith.constant 0 : i32
    %c0_i32_0 = arith.constant 0 : i32
    return %arg0, %c0_i32 : i32, i32
  }
  func.func @transform_1(%arg0: i32) -> (i32, i32) {
    %c0_i32 = arith.constant 0 : i32
    %c0_i32_0 = arith.constant 0 : i32
    return %arg0, %c0_i32 : i32, i32
  }
  func.func @transform_2(%arg0: i32) -> (i32, i32) {
    %c0_i32 = arith.constant 0 : i32
    %c0_i32_0 = arith.constant 0 : i32
    return %arg0, %c0_i32 : i32, i32
  }
  func.func @transform_3(%arg0: i32) -> (i32, i32) {
    %c0_i32 = arith.constant 0 : i32
    %c0_i32_0 = arith.constant 0 : i32
    return %arg0, %c0_i32 : i32, i32
  }
  func.func @transform_4(%arg0: i32) -> (i32, i32) {
    %c0_i32 = arith.constant 0 : i32
    %c0_i32_0 = arith.constant 0 : i32
    %c0_i32_1 = arith.constant 0 : i32
    return %c0_i32, %c0_i32_0 : i32, i32
  }
  func.func @transform_5(%arg0: i32) -> (i32, i32) {
    %c0_i32 = arith.constant 0 : i32
    %c0_i32_0 = arith.constant 0 : i32
    %c0_i32_1 = arith.constant 0 : i32
    return %c0_i32, %c0_i32_0 : i32, i32
  }
  func.func @transform_6(%arg0: i32) -> (i32, i32) {
    %c0_i32 = arith.constant 0 : i32
    %c0_i32_0 = arith.constant 0 : i32
    %c0_i32_1 = arith.constant 0 : i32
    return %c0_i32, %c0_i32_0 : i32, i32
  }
  func.func @transform_7(%arg0: i32) -> (i32, i32) {
    %c0_i32 = arith.constant 0 : i32
    %c0_i32_0 = arith.constant 0 : i32
    %c0_i32_1 = arith.constant 0 : i32
    return %c0_i32, %c0_i32_0 : i32, i32
  }
  func.func @transform_8(%arg0: i32) -> (i32, i32) {
    %c0_i32 = arith.constant 0 : i32
    %c0_i32_0 = arith.constant 0 : i32
    %c0_i32_1 = arith.constant 0 : i32
    return %c0_i32, %c0_i32_0 : i32, i32
  }
  func.func @transform_9(%arg0: i32) -> (i32, i32) {
    %c0_i32 = arith.constant 0 : i32
    %c0_i32_0 = arith.constant 0 : i32
    %c0_i32_1 = arith.constant 0 : i32
    return %c0_i32, %c0_i32_0 : i32, i32
  }
  func.func @transform_10(%arg0: i32) -> (i32, i32) {
    %c0_i32 = arith.constant 0 : i32
    %c0_i32_0 = arith.constant 0 : i32
    return %arg0, %c0_i32 : i32, i32
  }
}

</mosaic_0001>

<bundles_post_ra>
// kernel: tpu_custom_call.1
= control target key start
LH: loop header
LB: loop body
LE: loop exit
PB: predicated region body
PF: predicated region fallthrough
CT: control target
= control target key end

     0   :  { %15 = vsyncpa [#allocation3], 0  ;;  %s2574_s0 = inlined_call_operand.hbm [shape: f32[16,768], index: 0, kind: input, shape index: {}]   ;;  %s2575_s1 = inlined_call_operand.hbm [shape: f32[16,768], index: 1, kind: input, shape index: {}]   ;;  %s2576_s2 = inlined_call_operand.hbm [shape: f32[16,768], index: 2, kind: input, shape index: {}]   ;;  %s2577_s3 = inlined_call_operand.hbm [shape: f32[16,768], index: 3, kind: input, shape index: {}]   ;;  %s2578_s4 = inlined_call_operand.vmem [shape: f32[3,128], index: 4, kind: input, shape index: {}]   ;;  %s2579_s5 = inlined_call_operand.vmem [shape: f32[1,128], index: 5, kind: input, shape index: {}]   ;;  %s2580_s6 = inlined_call_operand.hbm [shape: bf16[512,512], index: 6, kind: input, shape index: {}]   ;;  %s2581_s7 = inlined_call_operand.vmem [shape: f32[1,512], index: 7, kind: input, shape index: {}]   ;;  %s2582_s8 = inlined_call_operand.hbm [shape: bf16[512,128], index: 8, kind: input, shape index: {}]   ;;  %s2583_s9 = inlined_call_operand.vmem [shape: f32[1,128], index: 9, kind: input, shape index: {}]   ;;  %s2584_s10 = inlined_call_operand.hbm [shape: bf16[16,128], index: 10, kind: output, shape index: {}]  }
   0x1   :  { %16 = vsyncpa [#allocation6], 0 }
   0x2   :  { %17 = vsyncpa [#allocation9], 0 }
   0x3   :  { %18 = vsyncpa [#allocation12], 0 }
   0x4   :  { %19 = vsyncpa [#allocation4], 0  ;;  %s2316_s13 = smov [#allocation5]   ;;  %s2317_s15 = smov [#allocation8]  }
   0x5   :  { %s37_s14 = sshll.u32 %s2316_s13, 4  ;;  %s61_s16 = sshll.u32 %s2317_s15, 4  ;;  %s38_s14 = int_to_ptr.vmem [resolvable:$true] %s37_s14  ;;  %s2384_s16 = int_to_ptr.vmem [resolvable:$true] %s61_s16 }
   0x6   :  { %s2152_s19 = scalar_lea.hbm %s2575_s1, 1536 }
   0x7   :  { %p2153_p0 = scmp.ne.s32.totalorder %s2575_s1, %s2152_s19  ;;  %p2156_p1 = scmp.lt.u32.totalorder %s2152_s19, %s2575_s1 }
   0x9   :  { %p2158_p2 = pnand %p2156_p1, %p2153_p0 }
   0xb   :  { %2161 = shalt.err (!%p2158_p2)
}
   0xc   :  { %s2162_s24 = scalar_lea.vmem %s38_s14, 1536  ;;  %p2167_p4 = scmp.lt.s32.totalorder %s38_s14, %s38_s14 }
   0xd   :  { %p2163_p3 = scmp.ne.s32.totalorder %s38_s14, %s2162_s24  ;;  %p2168_p5 = scmp.lt.s32.totalorder %s2162_s24, %s2162_s24 }
   0xf   :  { %p2169_p6 = por %p2168_p5, %p2167_p4 }
  0x11   :  { %p2170_p7 = pnand %p2169_p6, %p2163_p3 }
  0x13   :  { %2173 = shalt.err (!%p2170_p7)
}
  0x14   :  { %s2318_s25 = smov 768   ;;  %s2319_s26 = smov 48  }
  0x15   :  { %43 = dma.hbm_to_vmem [thread:$0]  %s2575_s1, 1536, %s38_s14, [#allocation6], %s2318_s25, %s2318_s25, %s2319_s26  }
  0x16   :  { %s2174_s11 = scalar_lea.hbm %s2577_s3, 1536 }
  0x17   :  { %p2175_p8 = scmp.ne.s32.totalorder %s2577_s3, %s2174_s11  ;;  %p2178_p9 = scmp.lt.u32.totalorder %s2174_s11, %s2577_s3 }
  0x19   :  { %p2180_p10 = pnand %p2178_p9, %p2175_p8 }
  0x1b   :  { %2183 = shalt.err (!%p2180_p10)
}
  0x1c   :  { %s2184_s18 = scalar_lea.vmem %s2384_s16, 1536  ;;  %p2189_p12 = scmp.lt.s32.totalorder %s2384_s16, %s2384_s16 }
  0x1d   :  { %p2185_p11 = scmp.ne.s32.totalorder %s2384_s16, %s2184_s18  ;;  %p2190_p13 = scmp.lt.s32.totalorder %s2184_s18, %s2184_s18 }
  0x1f   :  { %p2191_p0 = por %p2190_p13, %p2189_p12 }
  0x21   :  { %p2192_p1 = pnand %p2191_p0, %p2185_p11 }
  0x23   :  { %2195 = shalt.err (!%p2192_p1)
}
  0x24   :  { %67 = dma.hbm_to_vmem [thread:$0]  %s2577_s3, 1536, %s2384_s16, [#allocation9], %s2318_s25, %s2318_s25, %s2319_s26  }
  0x25   :  { %s2320_s19 = smov [#allocation2]   ;;  %s2321_s21 = smov [#allocation7]  }
  0x26   :  { %s25_s20 = sshll.u32 %s2320_s19, 4  ;;  %s49_s22 = sshll.u32 %s2321_s21, 4  ;;  %s26_s20 = int_to_ptr.vmem [resolvable:$true] %s25_s20  ;;  %s2421_s22 = int_to_ptr.vmem [resolvable:$true] %s49_s22 }
  0x27   :  { %s2196_s27 = scalar_lea.hbm %s2574_s0, 1536 }
  0x28   :  { %p2197_p2 = scmp.ne.s32.totalorder %s2574_s0, %s2196_s27  ;;  %p2200_p3 = scmp.lt.u32.totalorder %s2196_s27, %s2574_s0 }
  0x2a   :  { %p2202_p4 = pnand %p2200_p3, %p2197_p2 }
  0x2c   :  { %2205 = shalt.err (!%p2202_p4)
}
  0x2d   :  { %s2206_s3 = scalar_lea.vmem %s26_s20, 1536  ;;  %p2211_p6 = scmp.lt.s32.totalorder %s26_s20, %s26_s20 }
  0x2e   :  { %p2207_p5 = scmp.ne.s32.totalorder %s26_s20, %s2206_s3  ;;  %p2212_p7 = scmp.lt.s32.totalorder %s2206_s3, %s2206_s3 }
  0x30   :  { %p2213_p8 = por %p2212_p7, %p2211_p6 }
  0x32   :  { %p2214_p9 = pnand %p2213_p8, %p2207_p5 }
  0x34   :  { %2217 = shalt.err (!%p2214_p9)
}
  0x35   :  { %31 = dma.hbm_to_vmem [thread:$0]  %s2574_s0, 1536, %s26_s20, [#allocation3], %s2318_s25, %s2318_s25, %s2319_s26  }
  0x36   :  { %s2218_s17 = scalar_lea.hbm %s2576_s2, 1536 }
  0x37   :  { %p2219_p10 = scmp.ne.s32.totalorder %s2576_s2, %s2218_s17  ;;  %p2222_p11 = scmp.lt.u32.totalorder %s2218_s17, %s2576_s2 }
  0x39   :  { %p2224_p12 = pnand %p2222_p11, %p2219_p10 }
  0x3b   :  { %2227 = shalt.err (!%p2224_p12)
}
  0x3c   :  { %s2228_s21 = scalar_lea.vmem %s2421_s22, 1536  ;;  %p2233_p0 = scmp.lt.s32.totalorder %s2421_s22, %s2421_s22 }
  0x3d   :  { %p2229_p13 = scmp.ne.s32.totalorder %s2421_s22, %s2228_s21  ;;  %p2234_p1 = scmp.lt.s32.totalorder %s2228_s21, %s2228_s21 }
  0x3f   :  { %p2235_p2 = por %p2234_p1, %p2233_p0 }
  0x41   :  { %p2236_p3 = pnand %p2235_p2, %p2229_p13 }
  0x43   :  { %2239 = shalt.err (!%p2236_p3)
}
  0x44   :  { %55 = dma.hbm_to_vmem [thread:$0]  %s2576_s2, 1536, %s2421_s22, [#allocation6], %s2318_s25, %s2318_s25, %s2319_s26  }
  0x45   :  { %s2322_s23 = smov [#allocation10]   ;;  %s2240_s29 = scalar_lea.hbm %s2580_s6, 16384 }
  0x46   :  { %s77_s24 = sshll.u32 %s2322_s23, 4  ;;  %p2241_p4 = scmp.ne.s32.totalorder %s2580_s6, %s2240_s29  ;;  %s78_s24 = int_to_ptr.vmem [resolvable:$true] %s77_s24 }
  0x47   :  { %p2244_p5 = scmp.lt.u32.totalorder %s2240_s29, %s2580_s6 }
  0x49   :  { %p2246_p6 = pnand %p2244_p5, %p2241_p4 }
  0x4b   :  { %2249 = shalt.err (!%p2246_p6)
}
  0x4c   :  { %s2250_s12 = scalar_lea.vmem %s78_s24, 16384  ;;  %p2255_p8 = scmp.lt.s32.totalorder %s78_s24, %s78_s24 }
  0x4d   :  { %p2251_p7 = scmp.ne.s32.totalorder %s78_s24, %s2250_s12  ;;  %p2256_p9 = scmp.lt.s32.totalorder %s2250_s12, %s2250_s12 }
  0x4f   :  { %p2257_p10 = por %p2256_p9, %p2255_p8 }
  0x51   :  { %p2258_p11 = pnand %p2257_p10, %p2251_p7 }
  0x53   :  { %2261 = shalt.err (!%p2258_p11)
}
  0x54   :  { %s2323_s2 = smov 256   ;;  %s2324_s25 = smov 16  }
  0x55   :  { %83 = dma.hbm_to_vmem [thread:$0]  %s2580_s6, 16384, %s78_s24, [#allocation9], %s2323_s2, %s2323_s2, %s2324_s25  }
  0x56   :  { %s2325_s13 = smov [#allocation11]   ;;  %s2262_s1 = scalar_lea.hbm %s2582_s8, 4096 }
  0x57   :  { %s91_s15 = sshll.u32 %s2325_s13, 4  ;;  %p2263_p12 = scmp.ne.s32.totalorder %s2582_s8, %s2262_s1  ;;  %s92_s15 = int_to_ptr.vmem [resolvable:$true] %s91_s15 }
  0x58   :  { %p2266_p13 = scmp.lt.u32.totalorder %s2262_s1, %s2582_s8 }
  0x5a   :  { %p2268_p0 = pnand %p2266_p13, %p2263_p12 }
  0x5c   :  { %2271 = shalt.err (!%p2268_p0)
}
  0x5d   :  { %s2272_s20 = scalar_lea.vmem %s92_s15, 4096  ;;  %p2277_p2 = scmp.lt.s32.totalorder %s92_s15, %s92_s15 }
  0x5e   :  { %p2273_p1 = scmp.ne.s32.totalorder %s92_s15, %s2272_s20  ;;  %p2278_p3 = scmp.lt.s32.totalorder %s2272_s20, %s2272_s20 }
  0x60   :  { %p2279_p4 = por %p2278_p3, %p2277_p2 }
  0x62   :  { %p2280_p5 = pnand %p2279_p4, %p2273_p1 }
  0x64   :  { %2283 = shalt.err (!%p2280_p5)
}
  0x65   :  { %s2326_s6 = smov 64   ;;  %s2327_s23 = smov 4  }
  0x66   :  { %97 = dma.hbm_to_vmem [thread:$0]  %s2582_s8, 4096, %s92_s15, [#allocation12], %s2326_s6, %s2326_s6, %s2327_s23  }
  0x67   :  { %2306 = dma.done.wait [#allocation3], 1536  }
  0x68   :  { %2307 = vsyncadd [#allocation3], 4294965760 }
  0x69   :  { %2308 = dma.done.wait [#allocation6], 3072  }
  0x6a   :  { %2309 = vsyncadd [#allocation6], 4294964224 }
  0x6b   :  { %2310 = dma.done.wait [#allocation9], 17920  }
  0x6c   :  { %2311 = vsyncadd [#allocation9], 4294949376 }
  0x6d   :  { %2312 = dma.done.wait [#allocation12], 4096  }
  0x6e   :  { %2313 = vsyncadd [#allocation12], 4294963200  ;;  %v187_v0 = vld [vmem:[#allocation5] sm:$0xff]  ;;  %v188_v1 = vld [vmem:[#allocation5 + $0x8] sm:$0xff]  ;;  %s2328_s3 = smov [#allocation13]  }
  0x6f   :  { %v121_v2 = vld [vmem:[#allocation2] sm:$0xff]  ;;  %v191_v3 = vadd.f32 %v188_v1, %v187_v0  ;;  %v122_v4 = vld [vmem:[#allocation2 + $0x8] sm:$0xff]  ;;  %v189_v5 = vld [vmem:[#allocation5 + $0x30] sm:$0xff]  ;;  %s1669_s16 = sshll.u32 %s2328_s3, 4  ;;  %s1670_s16 = int_to_ptr.vmem [resolvable:$true] %s1669_s16 }
  0x70   :  { %v190_v6 = vld [vmem:[#allocation5 + $0x38] sm:$0xff]  ;;  %v125_v7 = vadd.f32 %v122_v4, %v121_v2  ;;  %v123_v8 = vld [vmem:[#allocation2 + $0x30] sm:$0xff]  ;;  %v205_v14 = vld [vmem:[#allocation5 + $0x40] sm:$0xff]  ;;  %p2289_p7 = scmp.lt.s32.totalorder %s1670_s16, %s1670_s16 }
  0x71   :  { %v124_v9 = vld [vmem:[#allocation2 + $0x38] sm:$0xff]  ;;  %192 = vadd.xlane.f32.xlu0 %v191_v3  ;;  %v194_v10 = vadd.f32 %v190_v6, %v189_v5  ;;  %v203_v12 = vld [vmem:[#allocation5 + $0x10] sm:$0xff]  ;;  %v206_v15 = vld [vmem:[#allocation5 + $0x48] sm:$0xff] }
  0x72   :  { %126 = vadd.xlane.f32.xlu1 %v125_v7  ;;  %v128_v11 = vadd.f32 %v124_v9, %v123_v8  ;;  %v204_v13 = vld [vmem:[#allocation5 + $0x18] sm:$0xff]  ;;  %v210_v17 = vadd.f32 %v206_v15, %v205_v14  ;;  %v147_v18 = vld [vmem:[#allocation2 + $0x10] sm:$0xff]  ;;  %v149_v20 = vld [vmem:[#allocation2 + $0x40] sm:$0xff] }
  0x73   :  { %v207_v16 = vadd.f32 %v204_v13, %v203_v12  ;;  %v148_v19 = vld [vmem:[#allocation2 + $0x18] sm:$0xff]  ;;  %v150_v21 = vld [vmem:[#allocation2 + $0x48] sm:$0xff]  ;;  %v219_v24 = vld [vmem:[#allocation5 + $0x20] sm:$0xff] }
  0x74   :  { %v151_v22 = vadd.f32 %v148_v19, %v147_v18  ;;  %v154_v23 = vadd.f32 %v150_v21, %v149_v20  ;;  %v220_v25 = vld [vmem:[#allocation5 + $0x28] sm:$0xff]  ;;  %v221_v26 = vld [vmem:[#allocation5 + $0x50] sm:$0xff]  ;;  %v222_v27 = vld [vmem:[#allocation5 + $0x58] sm:$0xff] }
  0x75   :  { %195 = vadd.xlane.f32.xlu0 %v194_v10  ;;  %v167_v28 = vld [vmem:[#allocation2 + $0x20] sm:$0xff]  ;;  %v223_v29 = vadd.f32 %v220_v25, %v219_v24  ;;  %v168_v30 = vld [vmem:[#allocation2 + $0x28] sm:$0xff]  ;;  %v169_v31 = vld [vmem:[#allocation2 + $0x50] sm:$0xff]  ;;  %v226_v33 = vadd.f32 %v222_v27, %v221_v26 }
  0x76   :  { %129 = vadd.xlane.f32.xlu1 %v128_v11  ;;  %v170_v32 = vld [vmem:[#allocation2 + $0x58] sm:$0xff]  ;;  %v1928_v34 = vld [vmem:[#allocation10 + $0x4] ss:$16 sps:$4 sm:$0xff]   ;;  %v284_v37 = vld [vmem:[#allocation8 + $0x8] sm:$0xff]  ;;  %v171_v40 = vadd.f32 %v168_v30, %v167_v28 }
  0x77   :  { %v1930_v35 = vld [vmem:[#allocation10 + $0xc] ss:$16 sps:$4 sm:$0xff]   ;;  %v283_v36 = vld [vmem:[#allocation8] sm:$0xff]  ;;  %1125 = vmatprep.subr.bf16.mxu0 %v1928_v34  ;;  %v1933_v39 = vld [vmem:[#allocation10 + $0x8] ss:$16 sps:$4 sm:$0xff]   ;;  %v174_v44 = vadd.f32 %v170_v32, %v169_v31 }
  0x78   :  { %v1932_v38 = vld [vmem:[#allocation10] ss:$16 sps:$4 sm:$0xff]   ;;  %v286_v42 = vld [vmem:[#allocation8 + $0x38] sm:$0xff]  ;;  %1211 = vmatprep.subr.bf16.mxu1 %v1930_v35  ;;  %v1934_v43 = vld [vmem:[#allocation10 + $0x24] ss:$16 sps:$4 sm:$0xff]   ;;  %v287_v51 = vadd.f32 %v284_v37, %v283_v36 }
  0x79   :  { %208 = vadd.xlane.f32.xlu0 %v207_v16  ;;  %v285_v41 = vld [vmem:[#allocation8 + $0x30] sm:$0xff]  ;;  %1126 = vmatpush1.bf16.msra.mxu0 %v1932_v38  ;;  %v1936_v45 = vld [vmem:[#allocation10 + $0x2c] ss:$16 sps:$4 sm:$0xff]   ;;  %v1939_v47 = vld [vmem:[#allocation10 + $0x28] ss:$16 sps:$4 sm:$0xff]  }
  0x7a   :  { %211 = vadd.xlane.f32.xlu1 %v210_v17  ;;  %v1938_v46 = vld [vmem:[#allocation10 + $0x20] ss:$16 sps:$4 sm:$0xff]   ;;  %1212 = vmatpush1.bf16.msra.mxu1 %v1933_v39  ;;  %v236_v49 = vld [vmem:[#allocation7 + $0x8] sm:$0xff]  ;;  %v1940_v50 = vld [vmem:[#allocation10 + $0x44] ss:$16 sps:$4 sm:$0xff]   ;;  %v290_v56 = vadd.f32 %v286_v42, %v285_v41 }
  0x7b   :  { %1127 = vmatprep.subr.bf16.mxu0 %v1934_v43  ;;  %v235_v48 = vld [vmem:[#allocation7] sm:$0xff]  ;;  %1213 = vmatprep.subr.bf16.mxu1 %v1936_v45  ;;  %v237_v52 = vld [vmem:[#allocation7 + $0x30] sm:$0xff]  ;;  %v238_v53 = vld [vmem:[#allocation7 + $0x38] sm:$0xff] }
  0x7c   :  { %v1942_v54 = vld [vmem:[#allocation10 + $0x4c] ss:$16 sps:$4 sm:$0xff]   ;;  %v1944_v55 = vld [vmem:[#allocation10 + $0x40] ss:$16 sps:$4 sm:$0xff]   ;;  %v1945_v57 = vld [vmem:[#allocation10 + $0x48] ss:$16 sps:$4 sm:$0xff]   ;;  %v239_v62 = vadd.f32 %v236_v49, %v235_v48  ;;  %v242_v1 = vadd.f32 %v238_v53, %v237_v52 }
  0x7d   :  { %152 = vadd.xlane.f32.xlu0 %v151_v22  ;;  %1128 = vmatpush1.bf16.msra.mxu0 %v1938_v46  ;;  %v1946_v58 = vld [vmem:[#allocation10 + $0x64] ss:$16 sps:$4 sm:$0xff]   ;;  %v300_v60 = vld [vmem:[#allocation8 + $0x18] sm:$0xff]  ;;  %v302_v0 = vld [vmem:[#allocation8 + $0x48] sm:$0xff] }
  0x7e   :  { %155 = vadd.xlane.f32.xlu1 %v154_v23  ;;  %1214 = vmatpush1.bf16.msra.mxu1 %v1939_v47  ;;  %v299_v59 = vld [vmem:[#allocation8 + $0x10] sm:$0xff]  ;;  %v1948_v61 = vld [vmem:[#allocation10 + $0x6c] ss:$16 sps:$4 sm:$0xff]   ;;  %v301_v63 = vld [vmem:[#allocation8 + $0x40] sm:$0xff] }
  0x7f   :  { %1129 = vmatprep.subr.bf16.mxu0 %v1940_v50  ;;  %1215 = vmatprep.subr.bf16.mxu1 %v1942_v54  ;;  %v1950_v2 = vld [vmem:[#allocation10 + $0x60] ss:$16 sps:$4 sm:$0xff]   ;;  %v1951_v3 = vld [vmem:[#allocation10 + $0x68] ss:$16 sps:$4 sm:$0xff]   ;;  %v1952_v4 = vld [vmem:[#allocation10 + $0x84] ss:$16 sps:$4 sm:$0xff]   ;;  %v303_v8 = vadd.f32 %v300_v60, %v299_v59  ;;  %v306_v12 = vadd.f32 %v302_v0, %v301_v63 }
  0x80   :  { %v251_v5 = vld [vmem:[#allocation7 + $0x10] sm:$0xff]  ;;  %v252_v6 = vld [vmem:[#allocation7 + $0x18] sm:$0xff]  ;;  %v253_v9 = vld [vmem:[#allocation7 + $0x40] sm:$0xff] }
  0x81   :  { %224 = vadd.xlane.f32.xlu0 %v223_v29  ;;  %1130 = vmatpush1.bf16.msra.mxu0 %v1944_v55  ;;  %v1954_v7 = vld [vmem:[#allocation10 + $0x8c] ss:$16 sps:$4 sm:$0xff]   ;;  %v1956_v11 = vld [vmem:[#allocation10 + $0x80] ss:$16 sps:$4 sm:$0xff]   ;;  %v1957_v13 = vld [vmem:[#allocation10 + $0x88] ss:$16 sps:$4 sm:$0xff]   ;;  %v255_v18 = vadd.f32 %v252_v6, %v251_v5 }
  0x82   :  { %227 = vadd.xlane.f32.xlu1 %v226_v33  ;;  %1216 = vmatpush1.bf16.msra.mxu1 %v1945_v57  ;;  %v254_v10 = vld [vmem:[#allocation7 + $0x48] sm:$0xff]  ;;  %v1958_v14 = vld [vmem:[#allocation10 + $0xa4] ss:$16 sps:$4 sm:$0xff]   ;;  %v318_v20 = vld [vmem:[#allocation8 + $0x58] sm:$0xff] }
  0x83   :  { %1131 = vmatprep.subr.bf16.mxu0 %v1946_v58  ;;  %1217 = vmatprep.subr.bf16.mxu1 %v1948_v61  ;;  %v315_v15 = vld [vmem:[#allocation8 + $0x20] sm:$0xff]  ;;  %v316_v16 = vld [vmem:[#allocation8 + $0x28] sm:$0xff]  ;;  %v317_v19 = vld [vmem:[#allocation8 + $0x50] sm:$0xff]  ;;  %v258_v21 = vadd.f32 %v254_v10, %v253_v9  ;;  %v133_v10 = vlaneseq }
  0x84   :  { %v1960_v17 = vld [vmem:[#allocation10 + $0xac] ss:$16 sps:$4 sm:$0xff]   ;;  %v1962_v22 = vld [vmem:[#allocation10 + $0xa0] ss:$16 sps:$4 sm:$0xff]   ;;  %v1963_v23 = vld [vmem:[#allocation10 + $0xa8] ss:$16 sps:$4 sm:$0xff]   ;;  %v319_v28 = vadd.f32 %v316_v16, %v315_v15  ;;  %v322_v32 = vadd.f32 %v318_v20, %v317_v19 }
  0x85   :  { %172 = vadd.xlane.f32.xlu0 %v171_v40  ;;  %1132 = vmatpush1.bf16.msra.mxu0 %v1950_v2  ;;  %v1964_v24 = vld [vmem:[#allocation10 + $0xc4] ss:$16 sps:$4 sm:$0xff]   ;;  %v268_v26 = vld [vmem:[#allocation7 + $0x28] sm:$0xff]  ;;  %v270_v30 = vld [vmem:[#allocation7 + $0x58] sm:$0xff] }
  0x86   :  { %175 = vadd.xlane.f32.xlu1 %v174_v44  ;;  %1218 = vmatpush1.bf16.msra.mxu1 %v1951_v3  ;;  %v267_v25 = vld [vmem:[#allocation7 + $0x20] sm:$0xff]  ;;  %v1966_v27 = vld [vmem:[#allocation10 + $0xcc] ss:$16 sps:$4 sm:$0xff]   ;;  %v269_v29 = vld [vmem:[#allocation7 + $0x50] sm:$0xff] }
  0x87   :  { %1133 = vmatprep.subr.bf16.mxu0 %v1952_v4  ;;  %1219 = vmatprep.subr.bf16.mxu1 %v1954_v7  ;;  %v1968_v31 = vld [vmem:[#allocation10 + $0xc0] ss:$16 sps:$4 sm:$0xff]   ;;  %v1969_v33 = vld [vmem:[#allocation10 + $0xc8] ss:$16 sps:$4 sm:$0xff]   ;;  %v1970_v34 = vld [vmem:[#allocation10 + $0xe4] ss:$16 sps:$4 sm:$0xff]   ;;  %v271_v36 = vadd.f32 %v268_v26, %v267_v25  ;;  %v274_v37 = vadd.f32 %v270_v30, %v269_v29 }
  0x88   :  { %v1972_v35 = vld [vmem:[#allocation10 + $0xec] ss:$16 sps:$4 sm:$0xff]   ;;  %v1974_v38 = vld [vmem:[#allocation10 + $0xe0] ss:$16 sps:$4 sm:$0xff]   ;;  %v1975_v39 = vld [vmem:[#allocation10 + $0xe8] ss:$16 sps:$4 sm:$0xff]  }
  0x89   :  { %288 = vadd.xlane.f32.xlu0 %v287_v51  ;;  %1134 = vmatpush1.bf16.msra.mxu0 %v1956_v11  ;;  %v1976_v40 = vld [vmem:[#allocation10 + $0x104] ss:$16 sps:$4 sm:$0xff]   ;;  %v1978_v41 = vld [vmem:[#allocation10 + $0x10c] ss:$16 sps:$4 sm:$0xff]   ;;  %v1980_v42 = vld [vmem:[#allocation10 + $0x100] ss:$16 sps:$4 sm:$0xff]  }
  0x8a   :  { %291 = vadd.xlane.f32.xlu1 %v290_v56  ;;  %1220 = vmatpush1.bf16.msra.mxu1 %v1957_v13  ;;  %v1981_v43 = vld [vmem:[#allocation10 + $0x108] ss:$16 sps:$4 sm:$0xff]   ;;  %v1982_v44 = vld [vmem:[#allocation10 + $0x124] ss:$16 sps:$4 sm:$0xff]   ;;  %v1984_v45 = vld [vmem:[#allocation10 + $0x12c] ss:$16 sps:$4 sm:$0xff]  }
  0x8b   :  { %1135 = vmatprep.subr.bf16.mxu0 %v1958_v14  ;;  %1221 = vmatprep.subr.bf16.mxu1 %v1960_v17  ;;  %v1986_v46 = vld [vmem:[#allocation10 + $0x120] ss:$16 sps:$4 sm:$0xff]   ;;  %v1987_v47 = vld [vmem:[#allocation10 + $0x128] ss:$16 sps:$4 sm:$0xff]   ;;  %v1988_v48 = vld [vmem:[#allocation10 + $0x144] ss:$16 sps:$4 sm:$0xff]  }
  0x8c   :  { %v1990_v49 = vld [vmem:[#allocation10 + $0x14c] ss:$16 sps:$4 sm:$0xff]   ;;  %v1992_v50 = vld [vmem:[#allocation10 + $0x140] ss:$16 sps:$4 sm:$0xff]   ;;  %v1993_v51 = vld [vmem:[#allocation10 + $0x148] ss:$16 sps:$4 sm:$0xff]  }
  0x8d   :  { %240 = vadd.xlane.f32.xlu0 %v239_v62  ;;  %1136 = vmatpush1.bf16.msra.mxu0 %v1962_v22  ;;  %v1994_v52 = vld [vmem:[#allocation10 + $0x164] ss:$16 sps:$4 sm:$0xff]   ;;  %v1996_v53 = vld [vmem:[#allocation10 + $0x16c] ss:$16 sps:$4 sm:$0xff]   ;;  %v1998_v54 = vld [vmem:[#allocation10 + $0x160] ss:$16 sps:$4 sm:$0xff]  }
  0x8e   :  { %243 = vadd.xlane.f32.xlu1 %v242_v1  ;;  %1222 = vmatpush1.bf16.msra.mxu1 %v1963_v23  ;;  %v1999_v55 = vld [vmem:[#allocation10 + $0x168] ss:$16 sps:$4 sm:$0xff]   ;;  %v2000_v56 = vld [vmem:[#allocation10 + $0x184] ss:$16 sps:$4 sm:$0xff]   ;;  %v2002_v57 = vld [vmem:[#allocation10 + $0x18c] ss:$16 sps:$4 sm:$0xff]  }
  0x8f   :  { %1137 = vmatprep.subr.bf16.mxu0 %v1964_v24  ;;  %1223 = vmatprep.subr.bf16.mxu1 %v1966_v27  ;;  %v2004_v58 = vld [vmem:[#allocation10 + $0x180] ss:$16 sps:$4 sm:$0xff]   ;;  %v2005_v59 = vld [vmem:[#allocation10 + $0x188] ss:$16 sps:$4 sm:$0xff]   ;;  %v2006_v60 = vld [vmem:[#allocation10 + $0x1a4] ss:$16 sps:$4 sm:$0xff]  }
  0x90   :  { %v2008_v61 = vld [vmem:[#allocation10 + $0x1ac] ss:$16 sps:$4 sm:$0xff]   ;;  %v2010_v62 = vld [vmem:[#allocation10 + $0x1a0] ss:$16 sps:$4 sm:$0xff]   ;;  %v2011_v63 = vld [vmem:[#allocation10 + $0x1a8] ss:$16 sps:$4 sm:$0xff]  }
  0x91   :  { %304 = vadd.xlane.f32.xlu0 %v303_v8  ;;  %1138 = vmatpush1.bf16.msra.mxu0 %v1968_v31  ;;  %v2012_v0 = vld [vmem:[#allocation10 + $0x1c4] ss:$16 sps:$4 sm:$0xff]   ;;  %v2014_v1 = vld [vmem:[#allocation10 + $0x1cc] ss:$16 sps:$4 sm:$0xff]   ;;  %v2016_v2 = vld [vmem:[#allocation10 + $0x1c0] ss:$16 sps:$4 sm:$0xff]  }
  0x92   :  { %307 = vadd.xlane.f32.xlu1 %v306_v12  ;;  %1224 = vmatpush1.bf16.msra.mxu1 %v1969_v33  ;;  %v2017_v3 = vld [vmem:[#allocation10 + $0x1c8] ss:$16 sps:$4 sm:$0xff]   ;;  %v2018_v4 = vld [vmem:[#allocation10 + $0x1e4] ss:$16 sps:$4 sm:$0xff]   ;;  %v2020_v5 = vld [vmem:[#allocation10 + $0x1ec] ss:$16 sps:$4 sm:$0xff]  }
  0x93   :  { %1139 = vmatprep.subr.bf16.mxu0 %v1970_v34  ;;  %1225 = vmatprep.subr.bf16.mxu1 %v1972_v35  ;;  %v2022_v6 = vld [vmem:[#allocation10 + $0x1e0] ss:$16 sps:$4 sm:$0xff]   ;;  %v2023_v7 = vld [vmem:[#allocation10 + $0x1e8] ss:$16 sps:$4 sm:$0xff]   ;;  %v2026_v8 = vld [vmem:[#allocation10 + $0x204] ss:$16 sps:$4 sm:$0xff]  }
  0x94   :  { %v2029_v9 = vld [vmem:[#allocation10 + $0x20c] ss:$16 sps:$4 sm:$0xff]   ;;  %v2485_v12 = vshrl.u32 %v133_v10, 7  ;;  %v119_v17 = vld [vmem:[%s2578_s4] sm:$0x7] }
  0x95   :  { %256 = vadd.xlane.f32.xlu0 %v255_v18  ;;  %1140 = vmatpush1.bf16.msra.mxu0 %v1974_v38  ;;  %v2032_v10 = vld [vmem:[#allocation10 + $0x224] ss:$16 sps:$4 sm:$0xff]  }
  0x96   :  { %259 = vadd.xlane.f32.xlu1 %v258_v21  ;;  %1226 = vmatpush1.bf16.msra.mxu1 %v1975_v39  ;;  %v135_v15 = vsub.s32 0, %v2485_v12  ;;  %v161_v18 = vsub.s32 1, %v2485_v12  ;;  %v181_v26 = vsub.s32 2, %v2485_v12 }
  0x97   :  { %1141 = vmatprep.subr.bf16.mxu0 %v1976_v40  ;;  %1227 = vmatprep.subr.bf16.mxu1 %v1978_v41 }
  0x98   :  { %v2494_v20 = vrot.slane %v119_v17, %v135_v15  ;;  %v2498_v24 = vrot.slane %v119_v17, %v161_v18 }
  0x99   :  { %320 = vadd.xlane.f32.xlu0 %v319_v28  ;;  %1142 = vmatpush1.bf16.msra.mxu0 %v1980_v42 }
  0x9a   :  { %323 = vadd.xlane.f32.xlu1 %v322_v32  ;;  %1228 = vmatpush1.bf16.msra.mxu1 %v1981_v43  ;;  %v2505_v32 = vld [vmem:[%s2579_s5] ss:$0 sm:$0xff] }
  0x9b   :  { %1143 = vmatprep.subr.bf16.mxu0 %v1982_v44  ;;  %1229 = vmatprep.subr.bf16.mxu1 %v1984_v45 }
  0x9d   :  { %272 = vadd.xlane.f32.xlu0 %v271_v36  ;;  %1144 = vmatpush1.bf16.msra.mxu0 %v1986_v46 }
  0x9e   :  { %275 = vadd.xlane.f32.xlu1 %v274_v37  ;;  %1230 = vmatpush1.bf16.msra.mxu1 %v1987_v47  ;;  %v2511_v37 = vrot.slane %v119_v17, %v181_v26 }
  0x9f   :  { %1145 = vmatprep.subr.bf16.mxu0 %v1988_v48  ;;  %1231 = vmatprep.subr.bf16.mxu1 %v1990_v49 }
  0xa1   :  { %1146 = vmatpush1.bf16.msra.mxu0 %v1992_v50 }
  0xa2   :  { %1232 = vmatpush1.bf16.msra.mxu1 %v1993_v51  ;;  %1147 = vmatprep.subr.bf16.mxu0 %v1994_v52 }
  0xa3   :  { %1233 = vmatprep.subr.bf16.mxu1 %v1996_v53 }
  0xa5   :  { %1148 = vmatpush1.bf16.msra.mxu0 %v1998_v54 }
  0xa6   :  { %1234 = vmatpush1.bf16.msra.mxu1 %v1999_v55  ;;  %1149 = vmatprep.subr.bf16.mxu0 %v2000_v56 }
  0xa7   :  { %1235 = vmatprep.subr.bf16.mxu1 %v2002_v57 }
  0xa9   :  { %1150 = vmatpush1.bf16.msra.mxu0 %v2004_v58 }
  0xaa   :  { %1236 = vmatpush1.bf16.msra.mxu1 %v2005_v59  ;;  %1151 = vmatprep.subr.bf16.mxu0 %v2006_v60 }
  0xab   :  { %1237 = vmatprep.subr.bf16.mxu1 %v2008_v61 }
  0xad   :  { %1152 = vmatpush1.bf16.msra.mxu0 %v2010_v62 }
  0xae   :  { %1238 = vmatpush1.bf16.msra.mxu1 %v2011_v63  ;;  %1153 = vmatprep.subr.bf16.mxu0 %v2012_v0 }
  0xaf   :  { %1239 = vmatprep.subr.bf16.mxu1 %v2014_v1 }
  0xb1   :  { %1154 = vmatpush1.bf16.msra.mxu0 %v2016_v2 }
  0xb2   :  { %1240 = vmatpush1.bf16.msra.mxu1 %v2017_v3  ;;  %1155 = vmatprep.subr.bf16.mxu0 %v2018_v4 }
  0xb3   :  { %1241 = vmatprep.subr.bf16.mxu1 %v2020_v5 }
  0xb5   :  { %1156 = vmatpush1.bf16.msra.mxu0 %v2022_v6 }
  0xb6   :  { %1242 = vmatpush1.bf16.msra.mxu1 %v2023_v7  ;;  %1168 = vmatprep.subr.bf16.mxu0 %v2026_v8  ;;  %v2024_v7 = vld [vmem:[#allocation10 + $0x200] ss:$16 sps:$4 sm:$0xff]   ;;  %v2027_v8 = vld [vmem:[#allocation10 + $0x208] ss:$16 sps:$4 sm:$0xff]  }
  0xb7   :  { %1254 = vmatprep.subr.bf16.mxu1 %v2029_v9 }
  0xfe   :  { %v193_v11 = vpop.xlane.xlu0 %192 }
  0xff   :  { %v127_v13 = vpop.xlane.xlu1 %126  ;;  %v197_v21 = vmul.f32 0.00390625, %v193_v11  ;;  %v2035_v11 = vld [vmem:[#allocation10 + $0x22c] ss:$16 sps:$4 sm:$0xff]  }
 0x100   :  { %v131_v30 = vmul.f32 0.00390625, %v127_v13 }
 0x101   :  { %v199_v29 = vmul.f32 %v197_v21, %v2494_v20 }
 0x102   :  { %v196_v14 = vpop.xlane.xlu0 %195  ;;  %v137_v42 = vmul.f32 %v2494_v20, %v131_v30 }
 0x103   :  { %v130_v16 = vpop.xlane.xlu1 %129  ;;  %v198_v23 = vmul.f32 0.00390625, %v196_v14  ;;  %v201_v41 = vadd.f32 %v2505_v32, %v199_v29 }
 0x104   :  { %v132_v34 = vmul.f32 0.00390625, %v130_v16  ;;  %v145_v55 = vadd.f32 %v2505_v32, %v137_v42  ;;  %v2044_v42 = vld [vmem:[#allocation10 + $0x264] ss:$16 sps:$4 sm:$0xff]  }
 0x105   :  { %v200_v33 = vmul.f32 %v198_v23, %v2494_v20  ;;  %v2033_v23 = vld [vmem:[#allocation10 + $0x228] ss:$16 sps:$4 sm:$0xff]  }
 0x106   :  { %v209_v19 = vpop.xlane.xlu0 %208  ;;  %v138_v46 = vmul.f32 %v2494_v20, %v132_v34 }
 0x107   :  { %v212_v22 = vpop.xlane.xlu1 %211  ;;  %v213_v25 = vmul.f32 0.00390625, %v209_v19  ;;  %v202_v45 = vadd.f32 %v2505_v32, %v200_v33 }
 0x108   :  { %v214_v27 = vmul.f32 0.00390625, %v212_v22  ;;  %v146_v59 = vadd.f32 %v2505_v32, %v138_v46  ;;  %v2030_v22 = vld [vmem:[#allocation10 + $0x220] ss:$16 sps:$4 sm:$0xff]  }
 0x109   :  { %v215_v35 = vmul.f32 %v213_v25, %v2498_v24 }
 0x10a   :  { %v153_v28 = vpop.xlane.xlu0 %152  ;;  %v216_v38 = vmul.f32 %v214_v27, %v2498_v24  ;;  %v2038_v27 = vld [vmem:[#allocation10 + $0x244] ss:$16 sps:$4 sm:$0xff]  }
 0x10b   :  { %v156_v31 = vpop.xlane.xlu1 %155  ;;  %v157_v36 = vmul.f32 0.00390625, %v153_v28  ;;  %v217_v48 = vadd.f32 %v215_v35, %v201_v41  ;;  %v2041_v28 = vld [vmem:[#allocation10 + $0x24c] ss:$16 sps:$4 sm:$0xff]   ;;  %v2039_v41 = vld [vmem:[#allocation10 + $0x248] ss:$16 sps:$4 sm:$0xff]  }
 0x10c   :  { %v158_v39 = vmul.f32 0.00390625, %v156_v31  ;;  %v218_v51 = vadd.f32 %v216_v38, %v202_v45 }
 0x10d   :  { %v163_v49 = vmul.f32 %v2498_v24, %v157_v36 }
 0x10e   :  { %v225_v40 = vpop.xlane.xlu0 %224  ;;  %v164_v52 = vmul.f32 %v2498_v24, %v158_v39 }
 0x10f   :  { %v229_v43 = vmul.f32 0.00390625, %v225_v40  ;;  %v228_v44 = vpop.xlane.xlu1 %227  ;;  %v165_v62 = vadd.f32 %v163_v49, %v145_v55  ;;  %v2036_v40 = vld [vmem:[#allocation10 + $0x240] ss:$16 sps:$4 sm:$0xff]   ;;  %v2053_v55 = vld [vmem:[#allocation10 + $0x28c] ss:$16 sps:$4 sm:$0xff]  }
 0x110   :  { %v230_v47 = vmul.f32 0.00390625, %v228_v44  ;;  %v166_v0 = vadd.f32 %v164_v52, %v146_v59  ;;  %v2045_v52 = vld [vmem:[#allocation10 + $0x268] ss:$16 sps:$4 sm:$0xff]  }
 0x111   :  { %v231_v50 = vmul.f32 %v229_v43, %v2511_v37  ;;  %v2047_v43 = vld [vmem:[#allocation10 + $0x26c] ss:$16 sps:$4 sm:$0xff]  }
 0x112   :  { %v232_v53 = vmul.f32 %v230_v47, %v2511_v37  ;;  %v173_v54 = vpop.xlane.xlu0 %172 }
 0x113   :  { %v177_v56 = vmul.f32 0.00390625, %v173_v54  ;;  %v176_v57 = vpop.xlane.xlu1 %175  ;;  %v233_v58 = vadd.f32 %v231_v50, %v217_v48  ;;  %v2050_v54 = vld [vmem:[#allocation10 + $0x284] ss:$16 sps:$4 sm:$0xff]  }
 0x114   :  { %v178_v60 = vmul.f32 0.00390625, %v176_v57  ;;  %v234_v61 = vadd.f32 %v232_v53, %v218_v51  ;;  %v2042_v51 = vld [vmem:[#allocation10 + $0x260] ss:$16 sps:$4 sm:$0xff]  }
 0x115   :  { %v183_v63 = vmul.f32 %v2511_v37, %v177_v56 }
 0x116   :  { %v184_v1 = vmul.f32 %v2511_v37, %v178_v60  ;;  %v332_v2 = vpack.c.bf16 %v234_v61, %v233_v58  ;;  %v289_v3 = vpop.xlane.xlu0 %288 }
 0x117   :  { %v185_v4 = vadd.f32 %v183_v63, %v165_v62  ;;  %v292_v5 = vpop.xlane.xlu1 %291  ;;  %v293_v14 = vmul.f32 0.00390625, %v289_v3  ;;  %v2056_v3 = vld [vmem:[#allocation10 + $0x2a4] ss:$16 sps:$4 sm:$0xff]  }
 0x118   :  { %v186_v6 = vadd.f32 %v184_v1, %v166_v0  ;;  %1157 = vmatprep.mubr.bf16.mxu0 %v332_v2  ;;  %1243 = vmatprep.mubr.bf16.mxu1 %v332_v2  ;;  %v294_v19 = vmul.f32 0.00390625, %v292_v5  ;;  %v2048_v0 = vld [vmem:[#allocation10 + $0x280] ss:$16 sps:$4 sm:$0xff]   ;;  %v2051_v1 = vld [vmem:[#allocation10 + $0x288] ss:$16 sps:$4 sm:$0xff]  }
 0x119   :  { %v295_v31 = vmul.f32 %v293_v14, %v2494_v20 }
 0x11a   :  { %v331_v9 = vpack.c.bf16 %v186_v6, %v185_v4  ;;  %v241_v13 = vpop.xlane.xlu0 %240  ;;  %v296_v36 = vmul.f32 %v294_v19, %v2494_v20  ;;  %v2059_v4 = vld [vmem:[#allocation10 + $0x2ac] ss:$16 sps:$4 sm:$0xff]  }
 0x11b   :  { %v245_v16 = vmul.f32 0.00390625, %v241_v13  ;;  %v244_v17 = vpop.xlane.xlu1 %243  ;;  %v297_v45 = vadd.f32 %v2505_v32, %v295_v31  ;;  %v2057_v13 = vld [vmem:[#allocation10 + $0x2a8] ss:$16 sps:$4 sm:$0xff]   ;;  %v2066_v31 = vld [vmem:[#allocation10 + $0x2e0] ss:$16 sps:$4 sm:$0xff]  }
 0x11c   :  { %1158 = vmatmul.mubr.bf16.vlgmr.msra.gmra.mrb[0].mxu0 %v331_v9  ;;  %1244 = vmatmul.mubr.bf16.vlgmr.msra.gmra.mrb[0].mxu1 %v331_v9  ;;  %v246_v21 = vmul.f32 0.00390625, %v244_v17  ;;  %v2065_v17 = vld [vmem:[#allocation10 + $0x2cc] ss:$16 sps:$4 sm:$0xff]  }
 0x11d   :  { %1169 = vmatpush1.bf16.msra.mxu0 %v2024_v7  ;;  %1255 = vmatpush1.bf16.msra.mxu1 %v2027_v8  ;;  %v247_v25 = vmul.f32 %v245_v16, %v2494_v20  ;;  %v2062_v16 = vld [vmem:[#allocation10 + $0x2c4] ss:$16 sps:$4 sm:$0xff]  }
 0x11e   :  { %1170 = vmatprep.subr.bf16.mxu0 %v2032_v10  ;;  %1256 = vmatprep.subr.bf16.mxu1 %v2035_v11  ;;  %v248_v29 = vmul.f32 %v246_v21, %v2494_v20  ;;  %v305_v30 = vpop.xlane.xlu0 %304  ;;  %v298_v20 = vadd.f32 %v2505_v32, %v296_v36  ;;  %v2054_v11 = vld [vmem:[#allocation10 + $0x2a0] ss:$16 sps:$4 sm:$0xff]   ;;  %v2075_v36 = vld [vmem:[#allocation10 + $0x308] ss:$16 sps:$4 sm:$0xff]  }
 0x11f   :  { %v249_v33 = vadd.f32 %v2505_v32, %v247_v25  ;;  %v309_v34 = vmul.f32 0.00390625, %v305_v30  ;;  %v308_v35 = vpop.xlane.xlu1 %307  ;;  %v2060_v25 = vld [vmem:[#allocation10 + $0x2c0] ss:$16 sps:$4 sm:$0xff]  }
 0x120   :  { %v250_v38 = vadd.f32 %v2505_v32, %v248_v29  ;;  %v310_v39 = vmul.f32 0.00390625, %v308_v35  ;;  %v2071_v29 = vld [vmem:[#allocation10 + $0x2ec] ss:$16 sps:$4 sm:$0xff]   ;;  %v2072_v35 = vld [vmem:[#allocation10 + $0x300] ss:$16 sps:$4 sm:$0xff]  }
 0x121   :  { %1171 = vmatpush1.bf16.msra.mxu0 %v2030_v22  ;;  %1257 = vmatpush1.bf16.msra.mxu1 %v2033_v23  ;;  %v311_v46 = vmul.f32 %v309_v34, %v2498_v24  ;;  %v2077_v34 = vld [vmem:[#allocation10 + $0x30c] ss:$16 sps:$4 sm:$0xff]  }
 0x122   :  { %1172 = vmatprep.subr.bf16.mxu0 %v2038_v27  ;;  %1258 = vmatprep.subr.bf16.mxu1 %v2041_v28  ;;  %v257_v44 = vpop.xlane.xlu0 %256  ;;  %v312_v49 = vmul.f32 %v310_v39, %v2498_v24  ;;  %v2063_v27 = vld [vmem:[#allocation10 + $0x2c8] ss:$16 sps:$4 sm:$0xff]   ;;  %v2068_v28 = vld [vmem:[#allocation10 + $0x2e4] ss:$16 sps:$4 sm:$0xff]   ;;  %v2083_v39 = vld [vmem:[#allocation10 + $0x32c] ss:$16 sps:$4 sm:$0xff]  }
 0x123   :  { %v261_v47 = vmul.f32 0.00390625, %v257_v44  ;;  %v260_v48 = vpop.xlane.xlu1 %259  ;;  %v313_v58 = vadd.f32 %v311_v46, %v297_v45  ;;  %v2084_v44 = vld [vmem:[#allocation10 + $0x340] ss:$16 sps:$4 sm:$0xff]   ;;  %v2087_v45 = vld [vmem:[#allocation10 + $0x348] ss:$16 sps:$4 sm:$0xff]  }
 0x124   :  { %v262_v50 = vmul.f32 0.00390625, %v260_v48  ;;  %v314_v61 = vadd.f32 %v312_v49, %v298_v20  ;;  %v2092_v46 = vld [vmem:[#allocation10 + $0x364] ss:$16 sps:$4 sm:$0xff]   ;;  %v2090_v48 = vld [vmem:[#allocation10 + $0x360] ss:$16 sps:$4 sm:$0xff]  }
 0x125   :  { %1173 = vmatpush1.bf16.msra.mxu0 %v2036_v40  ;;  %1259 = vmatpush1.bf16.msra.mxu1 %v2039_v41  ;;  %v263_v53 = vmul.f32 %v261_v47, %v2498_v24  ;;  %v2078_v40 = vld [vmem:[#allocation10 + $0x320] ss:$16 sps:$4 sm:$0xff]   ;;  %v2081_v41 = vld [vmem:[#allocation10 + $0x328] ss:$16 sps:$4 sm:$0xff]   ;;  %v2095_v47 = vld [vmem:[#allocation10 + $0x36c] ss:$16 sps:$4 sm:$0xff]  }
 0x126   :  { %1174 = vmatprep.subr.bf16.mxu0 %v2044_v42  ;;  %1260 = vmatprep.subr.bf16.mxu1 %v2047_v43  ;;  %v264_v56 = vmul.f32 %v262_v50, %v2498_v24  ;;  %v321_v57 = vpop.xlane.xlu0 %320  ;;  %v2086_v42 = vld [vmem:[#allocation10 + $0x344] ss:$16 sps:$4 sm:$0xff]   ;;  %v2089_v43 = vld [vmem:[#allocation10 + $0x34c] ss:$16 sps:$4 sm:$0xff]   ;;  %v2093_v20 = vld [vmem:[#allocation10 + $0x368] ss:$16 sps:$4 sm:$0xff]  }
 0x127   :  { %v265_v59 = vadd.f32 %v263_v53, %v249_v33  ;;  %v325_v60 = vmul.f32 0.00390625, %v321_v57  ;;  %v324_v32 = vpop.xlane.xlu1 %323  ;;  %v2069_v33 = vld [vmem:[#allocation10 + $0x2e8] ss:$16 sps:$4 sm:$0xff]   ;;  %v2098_v49 = vld [vmem:[#allocation10 + $0x384] ss:$16 sps:$4 sm:$0xff]  }
 0x128   :  { %v266_v62 = vadd.f32 %v264_v56, %v250_v38  ;;  %v326_v63 = vmul.f32 0.00390625, %v324_v32  ;;  %v2080_v38 = vld [vmem:[#allocation10 + $0x324] ss:$16 sps:$4 sm:$0xff]   ;;  %v2101_v50 = vld [vmem:[#allocation10 + $0x38c] ss:$16 sps:$4 sm:$0xff]  }
 0x129   :  { %1175 = vmatpush1.bf16.msra.mxu0 %v2042_v51  ;;  %1261 = vmatpush1.bf16.msra.mxu1 %v2045_v52  ;;  %v327_v2 = vmul.f32 %v325_v60, %v2511_v37  ;;  %v2096_v51 = vld [vmem:[#allocation10 + $0x380] ss:$16 sps:$4 sm:$0xff]   ;;  %v2099_v52 = vld [vmem:[#allocation10 + $0x388] ss:$16 sps:$4 sm:$0xff]   ;;  %v2104_v53 = vld [vmem:[#allocation10 + $0x3a4] ss:$16 sps:$4 sm:$0xff]  }
 0x12a   :  { %1176 = vmatprep.subr.bf16.mxu0 %v2050_v54  ;;  %1262 = vmatprep.subr.bf16.mxu1 %v2053_v55  ;;  %v328_v24 = vmul.f32 %v326_v63, %v2511_v37  ;;  %v273_v5 = vpop.xlane.xlu0 %272  ;;  %v2107_v54 = vld [vmem:[#allocation10 + $0x3ac] ss:$16 sps:$4 sm:$0xff]   ;;  %v2102_v55 = vld [vmem:[#allocation10 + $0x3a0] ss:$16 sps:$4 sm:$0xff]   ;;  %v2105_v56 = vld [vmem:[#allocation10 + $0x3a8] ss:$16 sps:$4 sm:$0xff]  }
 0x12b   :  { %v329_v6 = vadd.f32 %v327_v2, %v313_v58  ;;  %v277_v7 = vmul.f32 0.00390625, %v273_v5  ;;  %v276_v8 = vpop.xlane.xlu1 %275  ;;  %v2110_v57 = vld [vmem:[#allocation10 + $0x3c4] ss:$16 sps:$4 sm:$0xff]   ;;  %v2113_v58 = vld [vmem:[#allocation10 + $0x3cc] ss:$16 sps:$4 sm:$0xff]  }
 0x12c   :  { %v330_v9 = vadd.f32 %v328_v24, %v314_v61  ;;  %v278_v10 = vmul.f32 0.00390625, %v276_v8  ;;  %v2111_v60 = vld [vmem:[#allocation10 + $0x3c8] ss:$16 sps:$4 sm:$0xff]   ;;  %v2116_v32 = vld [vmem:[#allocation10 + $0x3e4] ss:$16 sps:$4 sm:$0xff]  }
 0x12d   :  { %1177 = vmatpush1.bf16.msra.mxu0 %v2048_v0  ;;  %1263 = vmatpush1.bf16.msra.mxu1 %v2051_v1  ;;  %v279_v14 = vmul.f32 %v277_v7, %v2511_v37  ;;  %v2119_v61 = vld [vmem:[#allocation10 + $0x3ec] ss:$16 sps:$4 sm:$0xff]   ;;  %v2117_v63 = vld [vmem:[#allocation10 + $0x3e8] ss:$16 sps:$4 sm:$0xff]   ;;  %v2120_v0 = vld [vmem:[#allocation11 + $0x40] sm:$0xff]  }
 0x12e   :  { %1178 = vmatprep.subr.bf16.mxu0 %v2056_v3  ;;  %1264 = vmatprep.subr.bf16.mxu1 %v2059_v4  ;;  %v280_v19 = vmul.f32 %v278_v10, %v2511_v37  ;;  %v334_v21 = vpack.c.bf16 %v330_v9, %v329_v6  ;;  %v2074_v37 = vld [vmem:[#allocation10 + $0x304] ss:$16 sps:$4 sm:$0xff]   ;;  %v2124_v4 = vld [vmem:[#allocation11 + $0x48] sm:$0xff]  }
 0x12f   :  { %v281_v22 = vadd.f32 %v279_v14, %v265_v59  ;;  %v2108_v59 = vld [vmem:[#allocation10 + $0x3c0] ss:$16 sps:$4 sm:$0xff]   ;;  %v2125_v24 = vld [vmem:[#allocation11 + $0xc8] sm:$0xff]   ;;  %v2134_v14 = vld [vmem:[#allocation11 + $0x18] sm:$0xff]  }
 0x130   :  { %v282_v23 = vadd.f32 %v280_v19, %v266_v62  ;;  %1200 = vmatprep.mubr.bf16.mxu0 %v334_v21  ;;  %1286 = vmatprep.mubr.bf16.mxu1 %v334_v21  ;;  %v2114_v62 = vld [vmem:[#allocation10 + $0x3e0] ss:$16 sps:$4 sm:$0xff]   ;;  %v2126_v5 = vld [vmem:[#allocation11 + $0x8] sm:$0xff]  }
 0x131   :  { %1179 = vmatpush1.bf16.msra.mxu0 %v2054_v11  ;;  %1265 = vmatpush1.bf16.msra.mxu1 %v2057_v13  ;;  %v2121_v1 = vld [vmem:[#allocation11 + $0xc0] sm:$0xff]   ;;  %v2127_v6 = vld [vmem:[#allocation11 + $0x88] sm:$0xff]   ;;  %v2128_v7 = vld [vmem:[#allocation11 + $0x50] sm:$0xff]  }
 0x132   :  { %1180 = vmatprep.subr.bf16.mxu0 %v2062_v16  ;;  %1266 = vmatprep.subr.bf16.mxu1 %v2065_v17  ;;  %v2542_v30 = vpack.c.bf16 %v282_v23, %v281_v22  ;;  %v2122_v2 = vld [vmem:[#allocation11] sm:$0xff]   ;;  %v2129_v8 = vld [vmem:[#allocation11 + $0xd0] sm:$0xff]   ;;  %v2132_v11 = vld [vmem:[#allocation11 + $0x58] sm:$0xff]  }
 0x133   :  { %v2123_v3 = vld [vmem:[#allocation11 + $0x80] sm:$0xff]   ;;  %v2130_v9 = vld [vmem:[#allocation11 + $0x10] sm:$0xff]   ;;  %v2133_v13 = vld [vmem:[#allocation11 + $0xd8] sm:$0xff]  }
 0x134   :  { %v2131_v10 = vld [vmem:[#allocation11 + $0x90] sm:$0xff]   ;;  %v2135_v16 = vld [vmem:[#allocation11 + $0x98] sm:$0xff]   ;;  %v2136_v17 = vld [vmem:[#allocation11 + $0x60] sm:$0xff]  }
 0x135   :  { %1181 = vmatpush1.bf16.msra.mxu0 %v2060_v25  ;;  %1267 = vmatpush1.bf16.msra.mxu1 %v2063_v27  ;;  %v2137_v19 = vld [vmem:[#allocation11 + $0xe0] sm:$0xff]   ;;  %v2140_v23 = vld [vmem:[#allocation11 + $0x68] sm:$0xff]  }
 0x136   :  { %1182 = vmatprep.subr.bf16.mxu0 %v2068_v28  ;;  %1268 = vmatprep.subr.bf16.mxu1 %v2071_v29  ;;  %v2138_v21 = vld [vmem:[#allocation11 + $0x20] sm:$0xff]   ;;  %v2141_v25 = vld [vmem:[#allocation11 + $0xe8] sm:$0xff]   ;;  %v2144_v29 = vld [vmem:[#allocation11 + $0x70] sm:$0xff]  }
 0x137   :  { %v2139_v22 = vld [vmem:[#allocation11 + $0xa0] sm:$0xff]   ;;  %v2142_v27 = vld [vmem:[#allocation11 + $0x28] sm:$0xff]  }
 0x138   :  { %v2143_v28 = vld [vmem:[#allocation11 + $0xa8] sm:$0xff]  }
 0x139   :  { %1183 = vmatpush1.bf16.msra.mxu0 %v2066_v31  ;;  %1269 = vmatpush1.bf16.msra.mxu1 %v2069_v33  ;;  %v2146_v31 = vld [vmem:[#allocation11 + $0x30] sm:$0xff]  }
 0x13a   :  { %1184 = vmatprep.subr.bf16.mxu0 %v2074_v37  ;;  %1270 = vmatprep.subr.bf16.mxu1 %v2077_v34  ;;  %v2147_v33 = vld [vmem:[#allocation11 + $0xb0] sm:$0xff]   ;;  %v2148_v37 = vld [vmem:[#allocation11 + $0x78] sm:$0xff]  }
 0x13b   :  { %v2149_v34 = vld [vmem:[#allocation11 + $0xf8] sm:$0xff]  }
 0x13d   :  { %1185 = vmatpush1.bf16.msra.mxu0 %v2072_v35  ;;  %1271 = vmatpush1.bf16.msra.mxu1 %v2075_v36  ;;  %v2150_v35 = vld [vmem:[#allocation11 + $0x38] sm:$0xff]  }
 0x13e   :  { %1186 = vmatprep.subr.bf16.mxu0 %v2080_v38  ;;  %1272 = vmatprep.subr.bf16.mxu1 %v2083_v39  ;;  %v2151_v36 = vld [vmem:[#allocation11 + $0xb8] sm:$0xff]   ;;  %v463_v38 = vld [vmem:[%s2581_s7] sm:$0xf]  ;;  %v479_v39 = vsub.s32 3, %v2485_v12 }
 0x141   :  { %1187 = vmatpush1.bf16.msra.mxu0 %v2078_v40  ;;  %1273 = vmatpush1.bf16.msra.mxu1 %v2081_v41  ;;  %v468_v40 = vrot.slane %v463_v38, %v135_v15  ;;  %v476_v41 = vrot.slane %v463_v38, %v181_v26 }
 0x142   :  { %1188 = vmatprep.subr.bf16.mxu0 %v2086_v42  ;;  %1274 = vmatprep.subr.bf16.mxu1 %v2089_v43  ;;  %v472_v42 = vrot.slane %v463_v38, %v161_v18  ;;  %v480_v43 = vrot.slane %v463_v38, %v479_v39 }
 0x145   :  { %1189 = vmatpush1.bf16.msra.mxu0 %v2084_v44  ;;  %1275 = vmatpush1.bf16.msra.mxu1 %v2087_v45 }
 0x146   :  { %1190 = vmatprep.subr.bf16.mxu0 %v2092_v46  ;;  %1276 = vmatprep.subr.bf16.mxu1 %v2095_v47 }
 0x149   :  { %1191 = vmatpush1.bf16.msra.mxu0 %v2090_v48  ;;  %1277 = vmatpush1.bf16.msra.mxu1 %v2093_v20 }
 0x14a   :  { %1192 = vmatprep.subr.bf16.mxu0 %v2098_v49  ;;  %1278 = vmatprep.subr.bf16.mxu1 %v2101_v50 }
 0x14d   :  { %1193 = vmatpush1.bf16.msra.mxu0 %v2096_v51  ;;  %1279 = vmatpush1.bf16.msra.mxu1 %v2099_v52 }
 0x14e   :  { %1194 = vmatprep.subr.bf16.mxu0 %v2104_v53  ;;  %1280 = vmatprep.subr.bf16.mxu1 %v2107_v54 }
 0x151   :  { %1195 = vmatpush1.bf16.msra.mxu0 %v2102_v55  ;;  %1281 = vmatpush1.bf16.msra.mxu1 %v2105_v56 }
 0x152   :  { %1196 = vmatprep.subr.bf16.mxu0 %v2110_v57  ;;  %1282 = vmatprep.subr.bf16.mxu1 %v2113_v58 }
 0x155   :  { %1197 = vmatpush1.bf16.msra.mxu0 %v2108_v59  ;;  %1283 = vmatpush1.bf16.msra.mxu1 %v2111_v60 }
 0x156   :  { %1198 = vmatprep.subr.bf16.mxu0 %v2116_v32  ;;  %1284 = vmatprep.subr.bf16.mxu1 %v2119_v61 }
 0x159   :  { %1199 = vmatpush1.bf16.msra.mxu0 %v2114_v62  ;;  %1285 = vmatpush1.bf16.msra.mxu1 %v2117_v63 }
 0x15a   :  { %1855 = vmatprep.subr.bf16.mxu0 %v2120_v0  ;;  %1877 = vmatprep.subr.bf16.mxu1 %v2121_v1 }
 0x15c   :  { %1201 = vmatmul.mubr.bf16.vlgmr.msra.gmra.mrb[0].mxu0 %v2542_v30  ;;  %1287 = vmatmul.mubr.bf16.vlgmr.msra.gmra.mrb[0].mxu1 %v2542_v30  ;;  %v2145_v30 = vld [vmem:[#allocation11 + $0xf0] sm:$0xff]  }
 0x15d   :  { %1856 = vmatpush3.bf16.msra.mxu0 %v2122_v2  ;;  %1878 = vmatpush3.bf16.msra.mxu1 %v2123_v3 }
 0x15e   :  { %1857 = vmatprep.subr.bf16.mxu0 %v2124_v4  ;;  %1879 = vmatprep.subr.bf16.mxu1 %v2125_v24  ;;  %v1813_v4 = vld [vmem:[%s2583_s9] ss:$0 sm:$0xff]  ;;  %s2284_s9 = scalar_lea.vmem %s1670_s16, 128 }
 0x15f   :  { %p2285_p6 = scmp.ne.s32.totalorder %s1670_s16, %s2284_s9  ;;  %p2290_p8 = scmp.lt.s32.totalorder %s2284_s9, %s2284_s9 }
 0x161   :  { %1858 = vmatpush3.bf16.msra.mxu0 %v2126_v5  ;;  %1880 = vmatpush3.bf16.msra.mxu1 %v2127_v6  ;;  %p2291_p9 = por %p2290_p8, %p2289_p7 }
 0x162   :  { %1859 = vmatprep.subr.bf16.mxu0 %v2128_v7  ;;  %1881 = vmatprep.subr.bf16.mxu1 %v2129_v8 }
 0x163   :  { %p2292_p10 = pnand %p2291_p9, %p2285_p6 }
 0x165   :  { %1860 = vmatpush3.bf16.msra.mxu0 %v2130_v9  ;;  %1882 = vmatpush3.bf16.msra.mxu1 %v2131_v10 }
 0x166   :  { %1861 = vmatprep.subr.bf16.mxu0 %v2132_v11  ;;  %1883 = vmatprep.subr.bf16.mxu1 %v2133_v13 }
 0x169   :  { %1862 = vmatpush3.bf16.msra.mxu0 %v2134_v14  ;;  %1884 = vmatpush3.bf16.msra.mxu1 %v2135_v16 }
 0x16a   :  { %1863 = vmatprep.subr.bf16.mxu0 %v2136_v17  ;;  %1885 = vmatprep.subr.bf16.mxu1 %v2137_v19 }
 0x16d   :  { %1864 = vmatpush3.bf16.msra.mxu0 %v2138_v21  ;;  %1886 = vmatpush3.bf16.msra.mxu1 %v2139_v22 }
 0x16e   :  { %1865 = vmatprep.subr.bf16.mxu0 %v2140_v23  ;;  %1887 = vmatprep.subr.bf16.mxu1 %v2141_v25 }
 0x171   :  { %1866 = vmatpush3.bf16.msra.mxu0 %v2142_v27  ;;  %1888 = vmatpush3.bf16.msra.mxu1 %v2143_v28 }
 0x172   :  { %1867 = vmatprep.subr.bf16.mxu0 %v2144_v29  ;;  %1889 = vmatprep.subr.bf16.mxu1 %v2145_v30 }
 0x175   :  { %1868 = vmatpush3.bf16.msra.mxu0 %v2146_v31  ;;  %1890 = vmatpush3.bf16.msra.mxu1 %v2147_v33 }
 0x176   :  { %1869 = vmatprep.subr.bf16.mxu0 %v2148_v37  ;;  %1891 = vmatprep.subr.bf16.mxu1 %v2149_v34 }
 0x179   :  { %1870 = vmatpush3.bf16.msra.mxu0 %v2150_v35  ;;  %1892 = vmatpush3.bf16.msra.mxu1 %v2151_v36 }
 0x22f   :  { %v1202_v44 = vpop.f32.mrb[0].mxu0  ;;  %v1288_v45 = vpop.f32.mrb[0].mxu1 }
 0x230   :  { %v1899_v46 = vadd.f32 %v1202_v44, %v468_v40  ;;  %v1903_v47 = vadd.f32 %v1288_v45, %v476_v41  ;;  %v1204_v48 = vpop.f32.mrb[1].mxu0  ;;  %v1290_v20 = vpop.f32.mrb[1].mxu1 }
 0x231   :  { %v1900_v49 = vadd.f32 %v1204_v48, %v472_v42  ;;  %v1904_v50 = vadd.f32 %v1290_v20, %v480_v43  ;;  %v1206_v51 = vpop.f32.mrb[2].mxu0  ;;  %v1292_v52 = vpop.f32.mrb[2].mxu1 }
 0x232   :  { %v1901_v53 = vadd.f32 %v1206_v51, %v468_v40  ;;  %v1905_v54 = vadd.f32 %v1292_v52, %v476_v41  ;;  %v1208_v15 = vpop.f32.mrb[3].mxu0  ;;  %v1294_v55 = vpop.f32.mrb[3].mxu1  ;;  %v1297_v57 = vmax.f32 %v1899_v46, 0.0  ;;  %v1299_v12 = vmax.f32 %v1903_v47, 0.0 }
 0x233   :  { %v1902_v56 = vadd.f32 %v1208_v15, %v472_v42  ;;  %v1906_v26 = vadd.f32 %v1294_v55, %v480_v43  ;;  %v1298_v59 = vmax.f32 %v1900_v49, 0.0  ;;  %v1300_v60 = vmax.f32 %v1904_v50, 0.0 }
 0x234   :  { %v1301_v18 = vmax.f32 %v1901_v53, 0.0  ;;  %v1303_v58 = vmax.f32 %v1905_v54, 0.0 }
 0x235   :  { %v1302_v32 = vmax.f32 %v1902_v56, 0.0  ;;  %v1304_v61 = vmax.f32 %v1906_v26, 0.0 }
 0x236   :  { %v1305_v62 = vpack.c.bf16 %v1301_v18, %v1297_v57  ;;  %v1307_v63 = vpack.c.bf16 %v1303_v58, %v1299_v12 }
 0x237   :  { %v1306_v0 = vpack.c.bf16 %v1302_v32, %v1298_v59  ;;  %v1308_v1 = vpack.c.bf16 %v1304_v61, %v1300_v60 }
 0x239   :  { %1604 = vmatprep.mubr.bf16.mxu0 %v1306_v0  ;;  %1645 = vmatprep.mubr.bf16.mxu1 %v1308_v1 }
 0x23a   :  { %1605 = vmatmul.mubr.bf16.vlgmr.msra.gmra.mrb[4].mxu0 %v1305_v62  ;;  %1646 = vmatmul.mubr.bf16.vlgmr.msra.gmra.mrb[4].mxu1 %v1307_v63 }
 0x30d   :  { %v1871_v2 = vpop.f32.mrb[4].mxu0  ;;  %v1893_v3 = vpop.f32.mrb[4].mxu1 }
 0x30e   :  { %v1872_v24 = vpop.f32.mrb[5].mxu0  ;;  %v1894_v5 = vpop.f32.mrb[5].mxu1 }
 0x30f   :  { %v1873_v6 = vadd.f32 %v1872_v24, %v1871_v2  ;;  %v1895_v7 = vadd.f32 %v1894_v5, %v1893_v3  ;;  %v1874_v8 = vpop.f32.mrb[6].mxu0  ;;  %v1896_v9 = vpop.f32.mrb[6].mxu1 }
 0x310   :  { %v1875_v10 = vpop.f32.mrb[7].mxu0  ;;  %v1897_v11 = vpop.f32.mrb[7].mxu1 }
 0x311   :  { %v1607_v13 = vadd.f32 %v1873_v6, %v1813_v4  ;;  %v1876_v14 = vadd.f32 %v1875_v10, %v1874_v8  ;;  %v1898_v16 = vadd.f32 %v1897_v11, %v1896_v9 }
 0x313   :  { %v1648_v17 = vadd.f32 %v1895_v7, %v1607_v13  ;;  %v1610_v19 = vadd.f32 %v1876_v14, %v1813_v4 }
 0x315   :  { %v1651_v21 = vadd.f32 %v1898_v16, %v1610_v19 }
 0x317   :  { %v1853_v22 = vpack.c.bf16 %v1651_v21, %v1648_v17 }
 0x319   :  { %1854 = vst [vmem:[#allocation13] sm:$0xff] %v1853_v22  }
 0x31a   :  { %2295 = shalt.err (!%p2292_p10)
}
 0x31b   :  { %s2296_s25 = scalar_lea.hbm %s2584_s10, 128 }
 0x31c   :  { %p2297_p11 = scmp.ne.s32.totalorder %s2584_s10, %s2296_s25  ;;  %p2300_p12 = scmp.lt.u32.totalorder %s2296_s25, %s2584_s10 }
 0x31e   :  { %p2302_p13 = pnand %p2300_p12, %p2297_p11 }
 0x320   :  { %2305 = shalt.err (!%p2302_p13)
}
 0x321   :  { %1675 = dma.vmem_to_hbm [thread:$0]  %s1670_s16, 128, %s2584_s10, [#allocation4], %s2326_s6, %s2326_s6, %s2327_s23  }
 0x322   :  { %2314 = dma.done.wait [#allocation4], 128  }
 0x323   :  { %2315 = vsyncadd [#allocation4], 4294967168 }
 0x324   :  { %1679 = vsyncpa [#allocation3], 1 }
 0x325   :  { %1680 = vsyncpa [#allocation6], 1 }
 0x326   :  { %1681 = vsyncpa [#allocation9], 1 }
 0x327   :  { %1682 = vsyncpa [#allocation12], 1 }
 0x328   :  { %1683 = vsyncpa [#allocation4], 1 }

</bundles_post_ra>
